<compile_context>
chip_gen: v7x
topology: tpu7x:2x2x1
jax: 0.10.0
libtpu: 0.0.40
codegen_flags: <defaults>
</compile_context>

<pallas_src>
import functools

import jax
import jax.numpy as jnp
from jax.experimental import pallas as pl
from jax.experimental.pallas import tpu as pltpu

LANE = 128


def _round_up(n, m):
    return ((n + m - 1) // m) * m


# ----------------------------------------------------------------------------
# Pallas kernel: one grid step = one transformer layer for one row tile.
# Grid = (row_tiles, n_layers); residual x is carried in the output block.
# ----------------------------------------------------------------------------
def vit_kernel(tokens_ref, pw_ref, posb_ref,
               g1_ref, be1_ref, wq_ref, wk_ref, wv_ref, wo_ref,
               g2_ref, be2_ref, w1_ref, b1_ref, w2_ref, b2_ref,
               o_ref, *, n_heads, seq, d_real):
    layer = pl.program_id(1)
    rows, d_pad = o_ref.shape
    bt = rows // seq                       # samples in this row tile
    dh = d_real // n_heads
    eps = 1e-5
    inv_d = 1.0 / d_real

    # ---- layer 0: patch-embedding linear + (bias + 2D sin/cos pos) add ----
    @pl.when(layer == 0)
    def _init():
        x0 = jnp.dot(tokens_ref[...], pw_ref[...],
                     preferred_element_type=jnp.float32)          # (rows, d_pad)
        # posb = pos_embd[mask] + patch_bias, shared over batch -> broadcast add
        x0 = x0.reshape(bt, seq, d_pad) + posb_ref[...][None]
        o_ref[...] = x0.reshape(rows, d_pad)

    x = o_ref[...]                         # residual, f32, resident across layers

    # Lane mask so mean-centered variance only sees the d_real real columns
    # (padded columns of x are exactly zero by construction; gamma/beta/bias
    # pads are zero, so LN keeps the zero-pad invariant).
    if d_pad == d_real:
        lane_mask = None
    else:
        col = jax.lax.broadcasted_iota(jnp.int32, (1, d_pad), 1)
        lane_mask = (col < d_real).astype(jnp.float32)

    def layernorm(t, g, b):
        mu = jnp.sum(t, axis=-1, keepdims=True) * inv_d
        c = t - mu
        if lane_mask is not None:
            c = c * lane_mask              # keep padded lanes exactly zero
        var = jnp.sum(c * c, axis=-1, keepdims=True) * inv_d
        return c * jax.lax.rsqrt(var + eps) * g + b

    # ---------------- LayerNorm 1 + multi-head self-attention ----------------
    xn = layernorm(x, g1_ref[...], be1_ref[...])
    xn_b = xn.astype(jnp.bfloat16)
    # Full-width, lane-dense projections (1/sqrt(dh) folded into Wq at prep).
    q = jnp.dot(xn_b, wq_ref[...], preferred_element_type=jnp.float32)
    k = jnp.dot(xn_b, wk_ref[...], preferred_element_type=jnp.float32)
    v = jnp.dot(xn_b, wv_ref[...], preferred_element_type=jnp.float32)
    q3 = q.reshape(bt, seq, d_pad)
    k3 = k.reshape(bt, seq, d_pad)
    v3 = v.reshape(bt, seq, d_pad)

    # Only the score/context einsums need the per-head (dh) axis.
    # TODO(synk): at production seq lengths tile this over KV blocks
    # (flash-style online softmax) to bound the (bt, P, P) score VMEM.
    ctx_heads = []
    for h in range(n_heads):               # static unroll over heads
        lo, hi = h * dh, (h + 1) * dh
        q_h, k_h, v_h = q3[:, :, lo:hi], k3[:, :, lo:hi], v3[:, :, lo:hi]
        s = jnp.einsum('bqd,bkd->bqk', q_h, k_h,
                       preferred_element_type=jnp.float32)        # (bt, P, P)
        s = s - jnp.max(s, axis=-1, keepdims=True)
        p = jnp.exp(s)
        p = p / jnp.sum(p, axis=-1, keepdims=True)                # exact softmax
        ctx_heads.append(jnp.einsum('bqk,bkd->bqd', p, v_h,
                                    preferred_element_type=jnp.float32))
    ctx = jnp.concatenate(ctx_heads, axis=-1)                     # (bt, P, d_real)
    ctx = ctx.reshape(rows, d_real).astype(jnp.bfloat16)
    attn = jnp.dot(ctx, wo_ref[...], preferred_element_type=jnp.float32)
    x = x + attn                                                  # residual

    # ---------------- LayerNorm 2 + MLP (linear -> GELU -> linear) ----------
    xn2 = layernorm(x, g2_ref[...], be2_ref[...]).astype(jnp.bfloat16)
    h1 = jnp.dot(xn2, w1_ref[...], preferred_element_type=jnp.float32) + b1_ref[...]
    # tanh-approx GELU (EUP tanh).  TODO(synk): exact erf GELU (F.gelu default)
    # if/when lax.erf lowers to Mosaic; difference is ~1e-3 max abs.
    h1 = 0.5 * h1 * (1.0 + jnp.tanh(0.7978845608028654
                                    * (h1 + 0.044715 * h1 * h1 * h1)))
    h2 = jnp.dot(h1.astype(jnp.bfloat16), w2_ref[...],
                 preferred_element_type=jnp.float32) + b2_ref[...]
    x = x + h2                                                    # residual

    o_ref[...] = x


def vit_pallas(tokens_flat, posb, kp, *, n_layers, n_heads, seq, d_real,
               batch_tiles):
    rows, f_pad = tokens_flat.shape
    d_pad = kp["patch_w"].shape[1]
    rows_t = rows // batch_tiles
    assert rows % batch_tiles == 0 and rows_t % seq == 0
    assert rows_t % 8 == 0 or rows_t == rows

    def per_layer(shape_tail):
        # Stacked per-layer weight: block over the layer axis (squeezed),
        # full otherwise -> Pallas prefetches layer l+1 behind layer l.
        return pl.BlockSpec((None,) + tuple(shape_tail),
                            lambda b, l: (l,) + (0,) * len(shape_tail))

    in_specs = [
        pl.BlockSpec((rows_t, f_pad), lambda b, l: (b, 0)),       # tokens
        pl.BlockSpec(kp["patch_w"].shape, lambda b, l: (0, 0)),   # patch weight
        pl.BlockSpec(posb.shape, lambda b, l: (0, 0)),            # pos + bias
        per_layer((1, d_pad)),                                    # g1
        per_layer((1, d_pad)),                                    # be1
        per_layer(kp["wq"].shape[1:]),                            # wq (scaled)
        per_layer(kp["wk"].shape[1:]),                            # wk
        per_layer(kp["wv"].shape[1:]),                            # wv
        per_layer(kp["wo"].shape[1:]),                            # wo
        per_layer((1, d_pad)),                                    # g2
        per_layer((1, d_pad)),                                    # be2
        per_layer(kp["w1"].shape[1:]),                            # w1
        per_layer(kp["b1"].shape[1:]),                            # b1
        per_layer(kp["w2"].shape[1:]),                            # w2
        per_layer(kp["b2"].shape[1:]),                            # b2
    ]
    out_spec = pl.BlockSpec((rows_t, d_pad), lambda b, l: (b, 0))

    return pl.pallas_call(
        functools.partial(vit_kernel, n_heads=n_heads, seq=seq, d_real=d_real),
        out_shape=jax.ShapeDtypeStruct((rows, d_pad), jnp.float32),
        grid=(batch_tiles, n_layers),
        in_specs=in_specs,
        out_specs=out_spec,
        compiler_params=pltpu.CompilerParams(
            # row tiles independent ("parallel", splits v7x's 2 TCs);
            # layer axis carries the residual in the output block ("arbitrary").
            dimension_semantics=("parallel", "arbitrary"),
            # Sized generously above actual toy usage; raise for production
            # ViT-B shapes (a bf16 layer is ~14 MiB, double-buffered).
            vmem_limit_bytes=32 * 1024 * 1024),
    )(tokens_flat, kp["patch_w"], posb,
      kp["g1"], kp["be1"], kp["wq"], kp["wk"], kp["wv"], kp["wo"],
      kp["g2"], kp["be2"], kp["w1"], kp["b1"], kp["w2"], kp["b2"])


# ----------------------------------------------------------------------------
# Parameter preparation: pad to lanes, fold attention scale into Wq,
# stack per-layer weights, cast matmul weights to bf16.
# ----------------------------------------------------------------------------
def prepare_params(params, n_heads):
    feat, d = params["patch_w_t"].shape
    d_mlp = params["layers"][0]["w1"].shape[1]
    dh = d // n_heads
    d_pad = _round_up(d, LANE)
    m_pad = _round_up(d_mlp, LANE)
    f_pad = _round_up(feat, LANE)
    scale = 1.0 / (dh ** 0.5)

    def pad2(a, r, c):
        return jnp.pad(a, ((0, r - a.shape[0]), (0, c - a.shape[1])))

    def stack(fn, dtype=jnp.float32):
        return jnp.stack([fn(ly) for ly in params["layers"]], 0).astype(dtype)

    return {
        "patch_w": pad2(params["patch_w_t"], f_pad, d_pad),       # f32 (one-time)
        "patch_b": pad2(params["patch_b"], 1, d_pad),
        "g1":  stack(lambda ly: pad2(ly["g1"], 1, d_pad)),
        "be1": stack(lambda ly: pad2(ly["be1"], 1, d_pad)),
        "wq":  stack(lambda ly: pad2(ly["wq"] * scale, d_pad, d_pad), jnp.bfloat16),
        "wk":  stack(lambda ly: pad2(ly["wk"], d_pad, d_pad), jnp.bfloat16),
        "wv":  stack(lambda ly: pad2(ly["wv"], d_pad, d_pad), jnp.bfloat16),
        # Wo rows stay d (= head-concat contraction width), cols lane-padded.
        "wo":  stack(lambda ly: pad2(ly["wo"], d, d_pad), jnp.bfloat16),
        "g2":  stack(lambda ly: pad2(ly["g2"], 1, d_pad)),
        "be2": stack(lambda ly: pad2(ly["be2"], 1, d_pad)),
        "w1":  stack(lambda ly: pad2(ly["w1"], d_pad, m_pad), jnp.bfloat16),
        "b1":  stack(lambda ly: pad2(ly["b1"], 1, m_pad)),
        "w2":  stack(lambda ly: pad2(ly["w2"], m_pad, d_pad), jnp.bfloat16),
        "b2":  stack(lambda ly: pad2(ly["b2"], 1, d_pad)),
    }


# ----------------------------------------------------------------------------
# Model glue (plain JAX)
# ----------------------------------------------------------------------------
def patchify(x, patch_size):
    # einops: 'b c (w pw) (h ph) -> b (w h) (c pw ph)'
    B, C, W, H = x.shape
    wp, hp = W // patch_size, H // patch_size
    x = x.reshape(B, C, wp, patch_size, hp, patch_size)
    x = jnp.transpose(x, (0, 2, 4, 1, 3, 5))          # (B, wp, hp, C, pw, ph)
    return x.reshape(B, wp * hp, C * patch_size * patch_size)


def make_pos_embd(d, size_p, temperature=10000.0):
    assert d % 4 == 0
    wp, hp = size_p
    gw, gh = jnp.meshgrid(jnp.arange(wp, dtype=jnp.float32),
                          jnp.arange(hp, dtype=jnp.float32), indexing="ij")
    pos_d = d // 4
    omega = jnp.arange(pos_d, dtype=jnp.float32) / pos_d
    omega = 1.0 / (temperature ** omega)
    out_w = gw.flatten()[:, None] * omega[None, :]
    out_h = gh.flatten()[:, None] * omega[None, :]
    return jnp.concatenate(
        [jnp.sin(out_w), jnp.cos(out_w), jnp.sin(out_h), jnp.cos(out_h)], axis=1)


def init_params(key, d, n_heads, n_layers, patch_size, size_p):
    in_ch = 3
    feat = patch_size * patch_size * in_ch
    d_mlp = int(d * 4 / 3)
    assert d % n_heads == 0

    def nrm(k, shape, scale=0.02):
        return scale * jax.random.normal(k, shape, dtype=jnp.float32)

    keys = jax.random.split(key, 2 + 7 * n_layers)
    params = {
        "patch_w_t": nrm(keys[0], (feat, d)),         # stored as W^T (x @ W)
        "patch_b": nrm(keys[1], (1, d)),
        "pos_embd": make_pos_embd(d, size_p),
        "layers": [],
    }
    for l in range(n_layers):
        k = keys[2 + 7 * l: 2 + 7 * (l + 1)]
        params["layers"].append({
            "g1": jnp.ones((1, d), jnp.float32),
            "be1": jnp.zeros((1, d), jnp.float32),
            "wq": nrm(k[0], (d, d)), "wk": nrm(k[1], (d, d)),
            "wv": nrm(k[2], (d, d)), "wo": nrm(k[3], (d, d)),
            "g2": jnp.ones((1, d), jnp.float32),
            "be2": jnp.zeros((1, d), jnp.float32),
            "w1": nrm(k[4], (d, d_mlp)), "b1": nrm(k[5], (1, d_mlp)),
            "w2": nrm(k[6], (d_mlp, d)), "b2": jnp.zeros((1, d), jnp.float32),
        })
    return params


@functools.partial(jax.jit, static_argnames=("n_heads", "patch_size"))
def vit_forward(x_img, mask, params, n_heads, patch_size):
    d = params["patch_w_t"].shape[1]
    n_layers = len(params["layers"])
    kp = prepare_params(params, n_heads)
    f_pad, d_pad = kp["patch_w"].shape

    patches = patchify(x_img, patch_size)             # (B, Np, C*pw*ph)
    patches = patches[:, mask, :]                     # token gather (mask)
    B, P, F = patches.shape
    tokens = jnp.pad(patches.reshape(B * P, F), ((0, 0), (0, f_pad - F)))

    # Positional embedding passed ONCE (no batch tiling); patch bias folded in.
    pos = jnp.pad(params["pos_embd"][mask], ((0, 0), (0, d_pad - d)))
    posb = pos + kp["patch_b"]                        # (P, d_pad)

    # Row-tile axis: 2 tiles when divisible (v7x: one per TensorCore).
    batch_tiles = 2 if (B % 2 == 0 and ((B // 2) * P) % 8 == 0) else 1

    out = vit_pallas(tokens, posb, kp, n_layers=n_layers, n_heads=n_heads,
                     seq=P, d_real=d, batch_tiles=batch_tiles)
    return out.reshape(B, P, d_pad)[:, :, :d]


# ----------------------------------------------------------------------------
# Pure-JAX reference (mirrors the kernel's bf16 weight/activation rounding).
# ----------------------------------------------------------------------------
def vit_reference(x_img, mask, params, n_heads, patch_size):
    d = params["patch_w_t"].shape[1]
    dh = d // n_heads
    scale = 1.0 / (dh ** 0.5)
    bf = lambda a: a.astype(jnp.bfloat16).astype(jnp.float32)

    x = patchify(x_img, patch_size)[:, mask, :] @ params["patch_w_t"]
    x = x + params["patch_b"] + params["pos_embd"][mask][None]

    def ln(t, g, b):
        mu = jnp.mean(t, axis=-1, keepdims=True)
        var = jnp.mean((t - mu) ** 2, axis=-1, keepdims=True)
        return (t - mu) * jax.lax.rsqrt(var + 1e-5) * g + b

    for ly in params["layers"]:
        xn = bf(ln(x, ly["g1"], ly["be1"]))
        q = xn @ bf(ly["wq"] * scale)
        k = xn @ bf(ly["wk"])
        v = xn @ bf(ly["wv"])
        heads = []
        for h in range(n_heads):
            sl = slice(h * dh, (h + 1) * dh)
            s = jnp.einsum('bqd,bkd->bqk', q[..., sl], k[..., sl])
            p = jax.nn.softmax(s, axis=-1)
            heads.append(jnp.einsum('bqk,bkd->bqd', p, v[..., sl]))
        ctx = bf(jnp.concatenate(heads, axis=-1))
        x = x + ctx @ bf(ly["wo"])
        xn2 = bf(ln(x, ly["g2"], ly["be2"]))
        h1 = xn2 @ bf(ly["w1"]) + ly["b1"]
        h1 = 0.5 * h1 * (1.0 + jnp.tanh(0.7978845608028654
                                        * (h1 + 0.044715 * h1 ** 3)))
        x = x + bf(h1) @ bf(ly["w2"]) + ly["b2"]
    return x


# ----------------------------------------------------------------------------
if __name__ == "__main__":
    d, n_heads, n_layers = 32, 4, 2
    p_dropout = 0.0                 # dropout is identity here (eval semantics)
    patch_size = 4
    size_p = (4, 4)                 # 16x16 image -> 16 patches
    batch = 2

    key = jax.random.PRNGKey(0)
    k_img, k_params = jax.random.split(key)
    x_img = jax.random.normal(
        k_img, (batch, 3, size_p[0] * patch_size, size_p[1] * patch_size),
        dtype=jnp.float32)
    mask = jnp.array([0, 2, 5, 7, 8, 10, 13, 15], dtype=jnp.int32)

    params = init_params(k_params, d, n_heads, n_layers, patch_size, size_p)

    out = vit_forward(x_img, mask, params, n_heads=n_heads, patch_size=patch_size)
    out = jax.block_until_ready(out)
    assert out.shape == (batch, mask.shape[0], d)

    ref = vit_reference(x_img, mask, params, n_heads, patch_size)
    max_err = float(jnp.max(jnp.abs(out - ref)))
    assert max_err < 2e-2, f"mismatch vs reference: {max_err}"

    print("KERNEL_OK")
</pallas_src>

<mosaic_0001>
module attributes {stable_mosaic.version = 11 : i64} {
  func.func @vit_kernel(%arg0: i32, %arg1: i32, %arg2: memref<8x128xf32, #tpu.memory_space<vmem>>, %arg3: memref<128x128xf32, #tpu.memory_space<vmem>>, %arg4: memref<8x128xf32, #tpu.memory_space<vmem>>, %arg5: memref<1x1x128xf32, #tpu.memory_space<vmem>>, %arg6: memref<1x1x128xf32, #tpu.memory_space<vmem>>, %arg7: memref<1x128x128xbf16, #tpu.memory_space<vmem>>, %arg8: memref<1x128x128xbf16, #tpu.memory_space<vmem>>, %arg9: memref<1x128x128xbf16, #tpu.memory_space<vmem>>, %arg10: memref<1x32x128xbf16, #tpu.memory_space<vmem>>, %arg11: memref<1x1x128xf32, #tpu.memory_space<vmem>>, %arg12: memref<1x1x128xf32, #tpu.memory_space<vmem>>, %arg13: memref<1x128x128xbf16, #tpu.memory_space<vmem>>, %arg14: memref<1x1x128xf32, #tpu.memory_space<vmem>>, %arg15: memref<1x128x128xbf16, #tpu.memory_space<vmem>>, %arg16: memref<1x1x128xf32, #tpu.memory_space<vmem>>, %arg17: memref<8x128xf32, #tpu.memory_space<vmem>>) attributes {dimension_semantics = [#tpu.dimension_semantics<parallel>, #tpu.dimension_semantics<arbitrary>], iteration_bounds = array<i64: 2, 2>, scalar_prefetch = 0 : i64, scratch_operands = 0 : i64, tpu.core_type = #tpu.core_type<tc>, window_params = [{transform_indices = @transform_0, window_bounds = array<i64: 8, 128>}, {pipeline_mode = #tpu.pipeline_mode<synchronous>, transform_indices = @transform_1, window_bounds = array<i64: 128, 128>}, {pipeline_mode = #tpu.pipeline_mode<synchronous>, transform_indices = @transform_2, window_bounds = array<i64: 8, 128>}, {transform_indices = @transform_3, window_bounds = array<i64: 1, 1, 128>}, {transform_indices = @transform_4, window_bounds = array<i64: 1, 1, 128>}, {transform_indices = @transform_5, window_bounds = array<i64: 1, 128, 128>}, {transform_indices = @transform_6, window_bounds = array<i64: 1, 128, 128>}, {transform_indices = @transform_7, window_bounds = array<i64: 1, 128, 128>}, {transform_indices = @transform_8, window_bounds = array<i64: 1, 32, 128>}, {transform_indices = @transform_9, window_bounds = array<i64: 1, 1, 128>}, {transform_indices = @transform_10, window_bounds = array<i64: 1, 1, 128>}, {transform_indices = @transform_11, window_bounds = array<i64: 1, 128, 128>}, {transform_indices = @transform_12, window_bounds = array<i64: 1, 1, 128>}, {transform_indices = @transform_13, window_bounds = array<i64: 1, 128, 128>}, {transform_indices = @transform_14, window_bounds = array<i64: 1, 1, 128>}, {transform_indices = @transform_15, window_bounds = array<i64: 8, 128>}]} {
    %c0_i32 = arith.constant 0 : i32
    %0 = arith.cmpi eq, %arg1, %c0_i32 : i32
    %1 = arith.extui %0 : i1 to i32
    %c0_i32_0 = arith.constant 0 : i32
    %2 = arith.cmpi ne, %1, %c0_i32_0 : i32
    scf.if %2 {
      %c0_75 = arith.constant 0 : index
      %c0_76 = arith.constant 0 : index
      %168 = vector.load %arg2[%c0_75, %c0_76] : memref<8x128xf32, #tpu.memory_space<vmem>>, vector<8x128xf32>
      %c0_77 = arith.constant 0 : index
      %c0_78 = arith.constant 0 : index
      %169 = vector.load %arg3[%c0_77, %c0_78] : memref<128x128xf32, #tpu.memory_space<vmem>>, vector<128x128xf32>
      %cst_79 = arith.constant dense<0.000000e+00> : vector<8x128xf32>
      %170 = tpu.matmul %168, %169, %cst_79 {dimension_numbers = #tpu.dot_dimension_numbers<[1], [0], [0], [1], [0, 0, 1, 1], [], []>} : vector<8x128xf32>, vector<128x128xf32>, vector<8x128xf32> -> vector<8x128xf32>
      %171 = vector.shape_cast %170 : vector<8x128xf32> to vector<1x8x128xf32>
      %c0_80 = arith.constant 0 : index
      %c0_81 = arith.constant 0 : index
      %172 = vector.load %arg4[%c0_80, %c0_81] : memref<8x128xf32, #tpu.memory_space<vmem>>, vector<8x128xf32>
      %173 = vector.shape_cast %172 : vector<8x128xf32> to vector<1x8x128xf32>
      %174 = arith.addf %171, %173 : vector<1x8x128xf32>
      %175 = vector.shape_cast %174 : vector<1x8x128xf32> to vector<8x128xf32>
      %c0_82 = arith.constant 0 : index
      %c0_83 = arith.constant 0 : index
      %176 = vector.load %arg17[%c0_82, %c0_83] : memref<8x128xf32, #tpu.memory_space<vmem>>, vector<8x128xf32>
      tpu.vector_store %arg17[%c0_82, %c0_83], %175 {strides = array<i32>} : memref<8x128xf32, #tpu.memory_space<vmem>>, vector<8x128xf32>,
    } else {
    }
    %c0 = arith.constant 0 : index
    %c0_1 = arith.constant 0 : index
    %3 = vector.load %arg17[%c0, %c0_1] : memref<8x128xf32, #tpu.memory_space<vmem>>, vector<8x128xf32>
    %4 = tpu.iota {dimensions = array<i32: 1>} : vector<1x128xi32>
    %c32_i32 = arith.constant 32 : i32
    %5 = vector.broadcast %c32_i32 : i32 to vector<1x128xi32>
    %6 = arith.cmpi slt, %4, %5 : vector<1x128xi32>
    %7 = arith.extui %6 : vector<1x128xi1> to vector<1x128xi32>
    %8 = arith.sitofp %7 : vector<1x128xi32> to vector<1x128xf32>
    %c0_2 = arith.constant 0 : index
    %c0_3 = arith.constant 0 : index
    %c0_4 = arith.constant 0 : index
    %9 = vector.load %arg5[%c0_2, %c0_3, %c0_4] : memref<1x1x128xf32, #tpu.memory_space<vmem>>, vector<1x1x128xf32>
    %10 = vector.shape_cast %9 : vector<1x1x128xf32> to vector<1x128xf32>
    %c0_5 = arith.constant 0 : index
    %c0_6 = arith.constant 0 : index
    %c0_7 = arith.constant 0 : index
    %11 = vector.load %arg6[%c0_5, %c0_6, %c0_7] : memref<1x1x128xf32, #tpu.memory_space<vmem>>, vector<1x1x128xf32>
    %12 = vector.shape_cast %11 : vector<1x1x128xf32> to vector<1x128xf32>
    %cst = arith.constant dense<0.000000e+00> : vector<8xf32>
    %13 = vector.multi_reduction <add>, %3, %cst [1] : vector<8x128xf32> to vector<8xf32>
    %14 = vector.shape_cast %13 : vector<8xf32> to vector<8x1xf32>
    %cst_8 = arith.constant 3.125000e-02 : f32
    %15 = vector.broadcast %cst_8 : f32 to vector<8x1xf32>
    %16 = arith.mulf %14, %15 : vector<8x1xf32>
    %17 = vector.broadcast %16 : vector<8x1xf32> to vector<8x128xf32>
    %18 = arith.subf %3, %17 : vector<8x128xf32>
    %19 = vector.broadcast %8 : vector<1x128xf32> to vector<8x128xf32>
    %20 = arith.mulf %18, %19 : vector<8x128xf32>
    %21 = arith.mulf %20, %20 : vector<8x128xf32>
    %cst_9 = arith.constant dense<0.000000e+00> : vector<8xf32>
    %22 = vector.multi_reduction <add>, %21, %cst_9 [1] : vector<8x128xf32> to vector<8xf32>
    %23 = vector.shape_cast %22 : vector<8xf32> to vector<8x1xf32>
    %cst_10 = arith.constant 3.125000e-02 : f32
    %24 = vector.broadcast %cst_10 : f32 to vector<8x1xf32>
    %25 = arith.mulf %23, %24 : vector<8x1xf32>
    %cst_11 = arith.constant 9.99999974E-6 : f32
    %26 = vector.broadcast %cst_11 : f32 to vector<8x1xf32>
    %27 = arith.addf %25, %26 : vector<8x1xf32>
    %28 = math.rsqrt %27 : vector<8x1xf32>
    %29 = vector.broadcast %28 : vector<8x1xf32> to vector<8x128xf32>
    %30 = arith.mulf %20, %29 : vector<8x128xf32>
    %31 = vector.broadcast %10 : vector<1x128xf32> to vector<8x128xf32>
    %32 = arith.mulf %30, %31 : vector<8x128xf32>
    %33 = vector.broadcast %12 : vector<1x128xf32> to vector<8x128xf32>
    %34 = arith.addf %32, %33 : vector<8x128xf32>
    %35 = arith.truncf %34 : vector<8x128xf32> to vector<8x128xbf16>
    %c0_12 = arith.constant 0 : index
    %c0_13 = arith.constant 0 : index
    %c0_14 = arith.constant 0 : index
    %36 = vector.load %arg7[%c0_12, %c0_13, %c0_14] : memref<1x128x128xbf16, #tpu.memory_space<vmem>>, vector<1x128x128xbf16>
    %37 = vector.shape_cast %36 : vector<1x128x128xbf16> to vector<128x128xbf16>
    %cst_15 = arith.constant dense<0.000000e+00> : vector<8x128xf32>
    %38 = tpu.matmul %35, %37, %cst_15 {dimension_numbers = #tpu.dot_dimension_numbers<[1], [0], [0], [1], [0, 0, 1, 1], [], []>} : vector<8x128xbf16>, vector<128x128xbf16>, vector<8x128xf32> -> vector<8x128xf32>
    %c0_16 = arith.constant 0 : index
    %c0_17 = arith.constant 0 : index
    %c0_18 = arith.constant 0 : index
    %39 = vector.load %arg8[%c0_16, %c0_17, %c0_18] : memref<1x128x128xbf16, #tpu.memory_space<vmem>>, vector<1x128x128xbf16>
    %40 = vector.shape_cast %39 : vector<1x128x128xbf16> to vector<128x128xbf16>
    %cst_19 = arith.constant dense<0.000000e+00> : vector<8x128xf32>
    %41 = tpu.matmul %35, %40, %cst_19 {dimension_numbers = #tpu.dot_dimension_numbers<[1], [0], [0], [1], [0, 0, 1, 1], [], []>} : vector<8x128xbf16>, vector<128x128xbf16>, vector<8x128xf32> -> vector<8x128xf32>
    %c0_20 = arith.constant 0 : index
    %c0_21 = arith.constant 0 : index
    %c0_22 = arith.constant 0 : index
    %42 = vector.load %arg9[%c0_20, %c0_21, %c0_22] : memref<1x128x128xbf16, #tpu.memory_space<vmem>>, vector<1x128x128xbf16>
    %43 = vector.shape_cast %42 : vector<1x128x128xbf16> to vector<128x128xbf16>
    %cst_23 = arith.constant dense<0.000000e+00> : vector<8x128xf32>
    %44 = tpu.matmul %35, %43, %cst_23 {dimension_numbers = #tpu.dot_dimension_numbers<[1], [0], [0], [1], [0, 0, 1, 1], [], []>} : vector<8x128xbf16>, vector<128x128xbf16>, vector<8x128xf32> -> vector<8x128xf32>
    %45 = vector.shape_cast %38 : vector<8x128xf32> to vector<1x8x128xf32>
    %46 = vector.shape_cast %41 : vector<8x128xf32> to vector<1x8x128xf32>
    %47 = vector.shape_cast %44 : vector<8x128xf32> to vector<1x8x128xf32>
    %48 = vector.extract_strided_slice %45 {offsets = [0, 0, 0], sizes = [1, 8, 8], strides = [1, 1, 1]} : vector<1x8x128xf32> to vector<1x8x8xf32>
    %49 = vector.extract_strided_slice %46 {offsets = [0, 0, 0], sizes = [1, 8, 8], strides = [1, 1, 1]} : vector<1x8x128xf32> to vector<1x8x8xf32>
    %50 = vector.extract_strided_slice %47 {offsets = [0, 0, 0], sizes = [1, 8, 8], strides = [1, 1, 1]} : vector<1x8x128xf32> to vector<1x8x8xf32>
    "tpu.trace_start"() <{level = 10 : i32, message = "bqd,bkd->bqk"}> : () -> ()
    %cst_24 = arith.constant dense<0.000000e+00> : vector<1x8x8xf32>
    %51 = tpu.matmul %48, %49, %cst_24 {dimension_numbers = #tpu.dot_dimension_numbers<[2], [2], [1], [1], [0, 0, 0, 1, 1, 1], [0], [0]>} : vector<1x8x8xf32>, vector<1x8x8xf32>, vector<1x8x8xf32> -> vector<1x8x8xf32>
    "tpu.trace_stop"() : () -> ()
    %cst_25 = arith.constant dense<0xFF800000> : vector<1x8xf32>
    %52 = vector.multi_reduction <maximumf>, %51, %cst_25 [2] : vector<1x8x8xf32> to vector<1x8xf32>
    %53 = vector.shape_cast %52 : vector<1x8xf32> to vector<1x8x1xf32>
    %54 = vector.broadcast %53 : vector<1x8x1xf32> to vector<1x8x8xf32>
    %55 = arith.subf %51, %54 : vector<1x8x8xf32>
    %56 = math.exp %55 : vector<1x8x8xf32>
    %cst_26 = arith.constant dense<0.000000e+00> : vector<1x8xf32>
    %57 = vector.multi_reduction <add>, %56, %cst_26 [2] : vector<1x8x8xf32> to vector<1x8xf32>
    %58 = vector.shape_cast %57 : vector<1x8xf32> to vector<1x8x1xf32>
    %59 = vector.broadcast %58 : vector<1x8x1xf32> to vector<1x8x8xf32>
    %60 = arith.divf %56, %59 : vector<1x8x8xf32>
    "tpu.trace_start"() <{level = 10 : i32, message = "bqk,bkd->bqd"}> : () -> ()
    %cst_27 = arith.constant dense<0.000000e+00> : vector<1x8x8xf32>
    %61 = tpu.matmul %60, %50, %cst_27 {dimension_numbers = #tpu.dot_dimension_numbers<[2], [1], [1], [2], [0, 0, 0, 1, 1, 2], [0], [0]>} : vector<1x8x8xf32>, vector<1x8x8xf32>, vector<1x8x8xf32> -> vector<1x8x8xf32>
    "tpu.trace_stop"() : () -> ()
    %62 = vector.extract_strided_slice %45 {offsets = [0, 0, 8], sizes = [1, 8, 8], strides = [1, 1, 1]} : vector<1x8x128xf32> to vector<1x8x8xf32>
    %63 = vector.extract_strided_slice %46 {offsets = [0, 0, 8], sizes = [1, 8, 8], strides = [1, 1, 1]} : vector<1x8x128xf32> to vector<1x8x8xf32>
    %64 = vector.extract_strided_slice %47 {offsets = [0, 0, 8], sizes = [1, 8, 8], strides = [1, 1, 1]} : vector<1x8x128xf32> to vector<1x8x8xf32>
    "tpu.trace_start"() <{level = 10 : i32, message = "bqd,bkd->bqk"}> : () -> ()
    %cst_28 = arith.constant dense<0.000000e+00> : vector<1x8x8xf32>
    %65 = tpu.matmul %62, %63, %cst_28 {dimension_numbers = #tpu.dot_dimension_numbers<[2], [2], [1], [1], [0, 0, 0, 1, 1, 1], [0], [0]>} : vector<1x8x8xf32>, vector<1x8x8xf32>, vector<1x8x8xf32> -> vector<1x8x8xf32>
    "tpu.trace_stop"() : () -> ()
    %cst_29 = arith.constant dense<0xFF800000> : vector<1x8xf32>
    %66 = vector.multi_reduction <maximumf>, %65, %cst_29 [2] : vector<1x8x8xf32> to vector<1x8xf32>
    %67 = vector.shape_cast %66 : vector<1x8xf32> to vector<1x8x1xf32>
    %68 = vector.broadcast %67 : vector<1x8x1xf32> to vector<1x8x8xf32>
    %69 = arith.subf %65, %68 : vector<1x8x8xf32>
    %70 = math.exp %69 : vector<1x8x8xf32>
    %cst_30 = arith.constant dense<0.000000e+00> : vector<1x8xf32>
    %71 = vector.multi_reduction <add>, %70, %cst_30 [2] : vector<1x8x8xf32> to vector<1x8xf32>
    %72 = vector.shape_cast %71 : vector<1x8xf32> to vector<1x8x1xf32>
    %73 = vector.broadcast %72 : vector<1x8x1xf32> to vector<1x8x8xf32>
    %74 = arith.divf %70, %73 : vector<1x8x8xf32>
    "tpu.trace_start"() <{level = 10 : i32, message = "bqk,bkd->bqd"}> : () -> ()
    %cst_31 = arith.constant dense<0.000000e+00> : vector<1x8x8xf32>
    %75 = tpu.matmul %74, %64, %cst_31 {dimension_numbers = #tpu.dot_dimension_numbers<[2], [1], [1], [2], [0, 0, 0, 1, 1, 2], [0], [0]>} : vector<1x8x8xf32>, vector<1x8x8xf32>, vector<1x8x8xf32> -> vector<1x8x8xf32>
    "tpu.trace_stop"() : () -> ()
    %76 = vector.extract_strided_slice %45 {offsets = [0, 0, 16], sizes = [1, 8, 8], strides = [1, 1, 1]} : vector<1x8x128xf32> to vector<1x8x8xf32>
    %77 = vector.extract_strided_slice %46 {offsets = [0, 0, 16], sizes = [1, 8, 8], strides = [1, 1, 1]} : vector<1x8x128xf32> to vector<1x8x8xf32>
    %78 = vector.extract_strided_slice %47 {offsets = [0, 0, 16], sizes = [1, 8, 8], strides = [1, 1, 1]} : vector<1x8x128xf32> to vector<1x8x8xf32>
    "tpu.trace_start"() <{level = 10 : i32, message = "bqd,bkd->bqk"}> : () -> ()
    %cst_32 = arith.constant dense<0.000000e+00> : vector<1x8x8xf32>
    %79 = tpu.matmul %76, %77, %cst_32 {dimension_numbers = #tpu.dot_dimension_numbers<[2], [2], [1], [1], [0, 0, 0, 1, 1, 1], [0], [0]>} : vector<1x8x8xf32>, vector<1x8x8xf32>, vector<1x8x8xf32> -> vector<1x8x8xf32>
    "tpu.trace_stop"() : () -> ()
    %cst_33 = arith.constant dense<0xFF800000> : vector<1x8xf32>
    %80 = vector.multi_reduction <maximumf>, %79, %cst_33 [2] : vector<1x8x8xf32> to vector<1x8xf32>
    %81 = vector.shape_cast %80 : vector<1x8xf32> to vector<1x8x1xf32>
    %82 = vector.broadcast %81 : vector<1x8x1xf32> to vector<1x8x8xf32>
    %83 = arith.subf %79, %82 : vector<1x8x8xf32>
    %84 = math.exp %83 : vector<1x8x8xf32>
    %cst_34 = arith.constant dense<0.000000e+00> : vector<1x8xf32>
    %85 = vector.multi_reduction <add>, %84, %cst_34 [2] : vector<1x8x8xf32> to vector<1x8xf32>
    %86 = vector.shape_cast %85 : vector<1x8xf32> to vector<1x8x1xf32>
    %87 = vector.broadcast %86 : vector<1x8x1xf32> to vector<1x8x8xf32>
    %88 = arith.divf %84, %87 : vector<1x8x8xf32>
    "tpu.trace_start"() <{level = 10 : i32, message = "bqk,bkd->bqd"}> : () -> ()
    %cst_35 = arith.constant dense<0.000000e+00> : vector<1x8x8xf32>
    %89 = tpu.matmul %88, %78, %cst_35 {dimension_numbers = #tpu.dot_dimension_numbers<[2], [1], [1], [2], [0, 0, 0, 1, 1, 2], [0], [0]>} : vector<1x8x8xf32>, vector<1x8x8xf32>, vector<1x8x8xf32> -> vector<1x8x8xf32>
    "tpu.trace_stop"() : () -> ()
    %90 = vector.extract_strided_slice %45 {offsets = [0, 0, 24], sizes = [1, 8, 8], strides = [1, 1, 1]} : vector<1x8x128xf32> to vector<1x8x8xf32>
    %91 = vector.extract_strided_slice %46 {offsets = [0, 0, 24], sizes = [1, 8, 8], strides = [1, 1, 1]} : vector<1x8x128xf32> to vector<1x8x8xf32>
    %92 = vector.extract_strided_slice %47 {offsets = [0, 0, 24], sizes = [1, 8, 8], strides = [1, 1, 1]} : vector<1x8x128xf32> to vector<1x8x8xf32>
    "tpu.trace_start"() <{level = 10 : i32, message = "bqd,bkd->bqk"}> : () -> ()
    %cst_36 = arith.constant dense<0.000000e+00> : vector<1x8x8xf32>
    %93 = tpu.matmul %90, %91, %cst_36 {dimension_numbers = #tpu.dot_dimension_numbers<[2], [2], [1], [1], [0, 0, 0, 1, 1, 1], [0], [0]>} : vector<1x8x8xf32>, vector<1x8x8xf32>, vector<1x8x8xf32> -> vector<1x8x8xf32>
    "tpu.trace_stop"() : () -> ()
    %cst_37 = arith.constant dense<0xFF800000> : vector<1x8xf32>
    %94 = vector.multi_reduction <maximumf>, %93, %cst_37 [2] : vector<1x8x8xf32> to vector<1x8xf32>
    %95 = vector.shape_cast %94 : vector<1x8xf32> to vector<1x8x1xf32>
    %96 = vector.broadcast %95 : vector<1x8x1xf32> to vector<1x8x8xf32>
    %97 = arith.subf %93, %96 : vector<1x8x8xf32>
    %98 = math.exp %97 : vector<1x8x8xf32>
    %cst_38 = arith.constant dense<0.000000e+00> : vector<1x8xf32>
    %99 = vector.multi_reduction <add>, %98, %cst_38 [2] : vector<1x8x8xf32> to vector<1x8xf32>
    %100 = vector.shape_cast %99 : vector<1x8xf32> to vector<1x8x1xf32>
    %101 = vector.broadcast %100 : vector<1x8x1xf32> to vector<1x8x8xf32>
    %102 = arith.divf %98, %101 : vector<1x8x8xf32>
    "tpu.trace_start"() <{level = 10 : i32, message = "bqk,bkd->bqd"}> : () -> ()
    %cst_39 = arith.constant dense<0.000000e+00> : vector<1x8x8xf32>
    %103 = tpu.matmul %102, %92, %cst_39 {dimension_numbers = #tpu.dot_dimension_numbers<[2], [1], [1], [2], [0, 0, 0, 1, 1, 2], [0], [0]>} : vector<1x8x8xf32>, vector<1x8x8xf32>, vector<1x8x8xf32> -> vector<1x8x8xf32>
    "tpu.trace_stop"() : () -> ()
    %104 = tpu.concatenate %61, %75, %89, %103 in 2 : vector<1x8x8xf32>, vector<1x8x8xf32>, vector<1x8x8xf32>, vector<1x8x8xf32> -> vector<1x8x32xf32>
    %105 = vector.shape_cast %104 : vector<1x8x32xf32> to vector<8x32xf32>
    %106 = arith.truncf %105 : vector<8x32xf32> to vector<8x32xbf16>
    %c0_40 = arith.constant 0 : index
    %c0_41 = arith.constant 0 : index
    %c0_42 = arith.constant 0 : index
    %107 = vector.load %arg10[%c0_40, %c0_41, %c0_42] : memref<1x32x128xbf16, #tpu.memory_space<vmem>>, vector<1x32x128xbf16>
    %108 = vector.shape_cast %107 : vector<1x32x128xbf16> to vector<32x128xbf16>
    %cst_43 = arith.constant dense<0.000000e+00> : vector<8x128xf32>
    %109 = tpu.matmul %106, %108, %cst_43 {dimension_numbers = #tpu.dot_dimension_numbers<[1], [0], [0], [1], [0, 0, 1, 1], [], []>} : vector<8x32xbf16>, vector<32x128xbf16>, vector<8x128xf32> -> vector<8x128xf32>
    %110 = arith.addf %3, %109 : vector<8x128xf32>
    %c0_44 = arith.constant 0 : index
    %c0_45 = arith.constant 0 : index
    %c0_46 = arith.constant 0 : index
    %111 = vector.load %arg11[%c0_44, %c0_45, %c0_46] : memref<1x1x128xf32, #tpu.memory_space<vmem>>, vector<1x1x128xf32>
    %112 = vector.shape_cast %111 : vector<1x1x128xf32> to vector<1x128xf32>
    %c0_47 = arith.constant 0 : index
    %c0_48 = arith.constant 0 : index
    %c0_49 = arith.constant 0 : index
    %113 = vector.load %arg12[%c0_47, %c0_48, %c0_49] : memref<1x1x128xf32, #tpu.memory_space<vmem>>, vector<1x1x128xf32>
    %114 = vector.shape_cast %113 : vector<1x1x128xf32> to vector<1x128xf32>
    %cst_50 = arith.constant dense<0.000000e+00> : vector<8xf32>
    %115 = vector.multi_reduction <add>, %110, %cst_50 [1] : vector<8x128xf32> to vector<8xf32>
    %116 = vector.shape_cast %115 : vector<8xf32> to vector<8x1xf32>
    %cst_51 = arith.constant 3.125000e-02 : f32
    %117 = vector.broadcast %cst_51 : f32 to vector<8x1xf32>
    %118 = arith.mulf %116, %117 : vector<8x1xf32>
    %119 = vector.broadcast %118 : vector<8x1xf32> to vector<8x128xf32>
    %120 = arith.subf %110, %119 : vector<8x128xf32>
    %121 = vector.broadcast %8 : vector<1x128xf32> to vector<8x128xf32>
    %122 = arith.mulf %120, %121 : vector<8x128xf32>
    %123 = arith.mulf %122, %122 : vector<8x128xf32>
    %cst_52 = arith.constant dense<0.000000e+00> : vector<8xf32>
    %124 = vector.multi_reduction <add>, %123, %cst_52 [1] : vector<8x128xf32> to vector<8xf32>
    %125 = vector.shape_cast %124 : vector<8xf32> to vector<8x1xf32>
    %cst_53 = arith.constant 3.125000e-02 : f32
    %126 = vector.broadcast %cst_53 : f32 to vector<8x1xf32>
    %127 = arith.mulf %125, %126 : vector<8x1xf32>
    %cst_54 = arith.constant 9.99999974E-6 : f32
    %128 = vector.broadcast %cst_54 : f32 to vector<8x1xf32>
    %129 = arith.addf %127, %128 : vector<8x1xf32>
    %130 = math.rsqrt %129 : vector<8x1xf32>
    %131 = vector.broadcast %130 : vector<8x1xf32> to vector<8x128xf32>
    %132 = arith.mulf %122, %131 : vector<8x128xf32>
    %133 = vector.broadcast %112 : vector<1x128xf32> to vector<8x128xf32>
    %134 = arith.mulf %132, %133 : vector<8x128xf32>
    %135 = vector.broadcast %114 : vector<1x128xf32> to vector<8x128xf32>
    %136 = arith.addf %134, %135 : vector<8x128xf32>
    %137 = arith.truncf %136 : vector<8x128xf32> to vector<8x128xbf16>
    %c0_55 = arith.constant 0 : index
    %c0_56 = arith.constant 0 : index
    %c0_57 = arith.constant 0 : index
    %138 = vector.load %arg13[%c0_55, %c0_56, %c0_57] : memref<1x128x128xbf16, #tpu.memory_space<vmem>>, vector<1x128x128xbf16>
    %139 = vector.shape_cast %138 : vector<1x128x128xbf16> to vector<128x128xbf16>
    %cst_58 = arith.constant dense<0.000000e+00> : vector<8x128xf32>
    %140 = tpu.matmul %137, %139, %cst_58 {dimension_numbers = #tpu.dot_dimension_numbers<[1], [0], [0], [1], [0, 0, 1, 1], [], []>} : vector<8x128xbf16>, vector<128x128xbf16>, vector<8x128xf32> -> vector<8x128xf32>
    %c0_59 = arith.constant 0 : index
    %c0_60 = arith.constant 0 : index
    %c0_61 = arith.constant 0 : index
    %141 = vector.load %arg14[%c0_59, %c0_60, %c0_61] : memref<1x1x128xf32, #tpu.memory_space<vmem>>, vector<1x1x128xf32>
    %142 = vector.shape_cast %141 : vector<1x1x128xf32> to vector<1x128xf32>
    %143 = vector.broadcast %142 : vector<1x128xf32> to vector<8x128xf32>
    %144 = arith.addf %140, %143 : vector<8x128xf32>
    %cst_62 = arith.constant 5.000000e-01 : f32
    %145 = vector.broadcast %cst_62 : f32 to vector<8x128xf32>
    %146 = arith.mulf %145, %144 : vector<8x128xf32>
    %cst_63 = arith.constant 4.471500e-02 : f32
    %147 = vector.broadcast %cst_63 : f32 to vector<8x128xf32>
    %148 = arith.mulf %147, %144 : vector<8x128xf32>
    %149 = arith.mulf %148, %144 : vector<8x128xf32>
    %150 = arith.mulf %149, %144 : vector<8x128xf32>
    %151 = arith.addf %144, %150 : vector<8x128xf32>
    %cst_64 = arith.constant 0.797884583 : f32
    %152 = vector.broadcast %cst_64 : f32 to vector<8x128xf32>
    %153 = arith.mulf %152, %151 : vector<8x128xf32>
    %154 = math.tanh %153 : vector<8x128xf32>
    %cst_65 = arith.constant 1.000000e+00 : f32
    %155 = vector.broadcast %cst_65 : f32 to vector<8x128xf32>
    %156 = arith.addf %155, %154 : vector<8x128xf32>
    %157 = arith.mulf %146, %156 : vector<8x128xf32>
    %158 = arith.truncf %157 : vector<8x128xf32> to vector<8x128xbf16>
    %c0_66 = arith.constant 0 : index
    %c0_67 = arith.constant 0 : index
    %c0_68 = arith.constant 0 : index
    %159 = vector.load %arg15[%c0_66, %c0_67, %c0_68] : memref<1x128x128xbf16, #tpu.memory_space<vmem>>, vector<1x128x128xbf16>
    %160 = vector.shape_cast %159 : vector<1x128x128xbf16> to vector<128x128xbf16>
    %cst_69 = arith.constant dense<0.000000e+00> : vector<8x128xf32>
    %161 = tpu.matmul %158, %160, %cst_69 {dimension_numbers = #tpu.dot_dimension_numbers<[1], [0], [0], [1], [0, 0, 1, 1], [], []>} : vector<8x128xbf16>, vector<128x128xbf16>, vector<8x128xf32> -> vector<8x128xf32>
    %c0_70 = arith.constant 0 : index
    %c0_71 = arith.constant 0 : index
    %c0_72 = arith.constant 0 : index
    %162 = vector.load %arg16[%c0_70, %c0_71, %c0_72] : memref<1x1x128xf32, #tpu.memory_space<vmem>>, vector<1x1x128xf32>
    %163 = vector.shape_cast %162 : vector<1x1x128xf32> to vector<1x128xf32>
    %164 = vector.broadcast %163 : vector<1x128xf32> to vector<8x128xf32>
    %165 = arith.addf %161, %164 : vector<8x128xf32>
    %166 = arith.addf %110, %165 : vector<8x128xf32>
    %c0_73 = arith.constant 0 : index
    %c0_74 = arith.constant 0 : index
    %167 = vector.load %arg17[%c0_73, %c0_74] : memref<8x128xf32, #tpu.memory_space<vmem>>, vector<8x128xf32>
    tpu.vector_store %arg17[%c0_73, %c0_74], %166 {strides = array<i32>} : memref<8x128xf32, #tpu.memory_space<vmem>>, vector<8x128xf32>,
    return
  }
  func.func @transform_0(%arg0: i32, %arg1: i32) -> (i32, i32) {
    %c0_i32 = arith.constant 0 : i32
    %c0_i32_0 = arith.constant 0 : i32
    return %arg0, %c0_i32 : i32, i32
  }
  func.func @transform_1(%arg0: i32, %arg1: i32) -> (i32, i32) {
    %c0_i32 = arith.constant 0 : i32
    %c0_i32_0 = arith.constant 0 : i32
    %c0_i32_1 = arith.constant 0 : i32
    return %c0_i32, %c0_i32_0 : i32, i32
  }
  func.func @transform_2(%arg0: i32, %arg1: i32) -> (i32, i32) {
    %c0_i32 = arith.constant 0 : i32
    %c0_i32_0 = arith.constant 0 : i32
    %c0_i32_1 = arith.constant 0 : i32
    return %c0_i32, %c0_i32_0 : i32, i32
  }
  func.func @transform_3(%arg0: i32, %arg1: i32) -> (i32, i32, i32) {
    %c0_i32 = arith.constant 0 : i32
    %c0_i32_0 = arith.constant 0 : i32
    %c0_i32_1 = arith.constant 0 : i32
    return %arg1, %c0_i32, %c0_i32_0 : i32, i32, i32
  }
  func.func @transform_4(%arg0: i32, %arg1: i32) -> (i32, i32, i32) {
    %c0_i32 = arith.constant 0 : i32
    %c0_i32_0 = arith.constant 0 : i32
    %c0_i32_1 = arith.constant 0 : i32
    return %arg1, %c0_i32, %c0_i32_0 : i32, i32, i32
  }
  func.func @transform_5(%arg0: i32, %arg1: i32) -> (i32, i32, i32) {
    %c0_i32 = arith.constant 0 : i32
    %c0_i32_0 = arith.constant 0 : i32
    %c0_i32_1 = arith.constant 0 : i32
    return %arg1, %c0_i32, %c0_i32_0 : i32, i32, i32
  }
  func.func @transform_6(%arg0: i32, %arg1: i32) -> (i32, i32, i32) {
    %c0_i32 = arith.constant 0 : i32
    %c0_i32_0 = arith.constant 0 : i32
    %c0_i32_1 = arith.constant 0 : i32
    return %arg1, %c0_i32, %c0_i32_0 : i32, i32, i32
  }
  func.func @transform_7(%arg0: i32, %arg1: i32) -> (i32, i32, i32) {
    %c0_i32 = arith.constant 0 : i32
    %c0_i32_0 = arith.constant 0 : i32
    %c0_i32_1 = arith.constant 0 : i32
    return %arg1, %c0_i32, %c0_i32_0 : i32, i32, i32
  }
  func.func @transform_8(%arg0: i32, %arg1: i32) -> (i32, i32, i32) {
    %c0_i32 = arith.constant 0 : i32
    %c0_i32_0 = arith.constant 0 : i32
    %c0_i32_1 = arith.constant 0 : i32
    return %arg1, %c0_i32, %c0_i32_0 : i32, i32, i32
  }
  func.func @transform_9(%arg0: i32, %arg1: i32) -> (i32, i32, i32) {
    %c0_i32 = arith.constant 0 : i32
    %c0_i32_0 = arith.constant 0 : i32
    %c0_i32_1 = arith.constant 0 : i32
    return %arg1, %c0_i32, %c0_i32_0 : i32, i32, i32
  }
  func.func @transform_10(%arg0: i32, %arg1: i32) -> (i32, i32, i32) {
    %c0_i32 = arith.constant 0 : i32
    %c0_i32_0 = arith.constant 0 : i32
    %c0_i32_1 = arith.constant 0 : i32
    return %arg1, %c0_i32, %c0_i32_0 : i32, i32, i32
  }
  func.func @transform_11(%arg0: i32, %arg1: i32) -> (i32, i32, i32) {
    %c0_i32 = arith.constant 0 : i32
    %c0_i32_0 = arith.constant 0 : i32
    %c0_i32_1 = arith.constant 0 : i32
    return %arg1, %c0_i32, %c0_i32_0 : i32, i32, i32
  }
  func.func @transform_12(%arg0: i32, %arg1: i32) -> (i32, i32, i32) {
    %c0_i32 = arith.constant 0 : i32
    %c0_i32_0 = arith.constant 0 : i32
    %c0_i32_1 = arith.constant 0 : i32
    return %arg1, %c0_i32, %c0_i32_0 : i32, i32, i32
  }
  func.func @transform_13(%arg0: i32, %arg1: i32) -> (i32, i32, i32) {
    %c0_i32 = arith.constant 0 : i32
    %c0_i32_0 = arith.constant 0 : i32
    %c0_i32_1 = arith.constant 0 : i32
    return %arg1, %c0_i32, %c0_i32_0 : i32, i32, i32
  }
  func.func @transform_14(%arg0: i32, %arg1: i32) -> (i32, i32, i32) {
    %c0_i32 = arith.constant 0 : i32
    %c0_i32_0 = arith.constant 0 : i32
    %c0_i32_1 = arith.constant 0 : i32
    return %arg1, %c0_i32, %c0_i32_0 : i32, i32, i32
  }
  func.func @transform_15(%arg0: i32, %arg1: i32) -> (i32, i32) {
    %c0_i32 = arith.constant 0 : i32
    %c0_i32_0 = arith.constant 0 : i32
    return %arg0, %c0_i32 : i32, i32
  }
}

</mosaic_0001>

<bundles_post_ra>
// kernel: vit_forward.1
= control target key start
LH: loop header
LB: loop body
LE: loop exit
PB: predicated region body
PF: predicated region fallthrough
CT: control target
= control target key end

     0   :  { %s3544_s0 = inlined_call_operand.vmem [shape: f32[16,128], index: 0, kind: input, shape index: {}]   ;;  %s3545_s1 = inlined_call_operand.vmem [shape: f32[128,128], index: 1, kind: input, shape index: {}]   ;;  %s3546_s2 = inlined_call_operand.vmem [shape: f32[8,128], index: 2, kind: input, shape index: {}]   ;;  %s3547_s3 = inlined_call_operand.vmem [shape: f32[2,1,128], index: 3, kind: input, shape index: {}]   ;;  %s3548_s4 = inlined_call_operand.vmem [shape: f32[2,1,128], index: 4, kind: input, shape index: {}]   ;;  %s3549_s5 = inlined_call_operand.vmem [shape: bf16[2,128,128], index: 5, kind: input, shape index: {}]   ;;  %s3550_s6 = inlined_call_operand.vmem [shape: bf16[2,128,128], index: 6, kind: input, shape index: {}]   ;;  %s3551_s7 = inlined_call_operand.vmem [shape: bf16[2,128,128], index: 7, kind: input, shape index: {}]   ;;  %s3552_s8 = inlined_call_operand.vmem [shape: bf16[2,32,128], index: 8, kind: input, shape index: {}]   ;;  %s3553_s9 = inlined_call_operand.vmem [shape: f32[2,1,128], index: 9, kind: input, shape index: {}]   ;;  %s3554_s10 = inlined_call_operand.vmem [shape: f32[2,1,128], index: 10, kind: input, shape index: {}]   ;;  %s3555_s11 = inlined_call_operand.vmem [shape: bf16[2,128,128], index: 11, kind: input, shape index: {}]   ;;  %s3556_s12 = inlined_call_operand.vmem [shape: f32[2,1,128], index: 12, kind: input, shape index: {}]   ;;  %s3557_s13 = inlined_call_operand.vmem [shape: bf16[2,128,128], index: 13, kind: input, shape index: {}]   ;;  %s3558_s14 = inlined_call_operand.vmem [shape: f32[2,1,128], index: 14, kind: input, shape index: {}]   ;;  %s3559_s15 = inlined_call_operand.hbm [shape: f32[16,128], index: 15, kind: output, shape index: {}]  }
   0x1   :  { %3576 = sst [smem:[#allocation18_spill]] %s3544_s0 }
   0x2   :  { %3577 = sst [smem:[#allocation19_spill]] %s3545_s1 }
   0x3   :  { %3578 = sst [smem:[#allocation20_spill]] %s3546_s2 }
   0x4   :  { %3579 = sst [smem:[#allocation21_spill]] %s3548_s4 }
   0x5   :  { %3580 = sst [smem:[#allocation22_spill]] %s3549_s5 }
   0x6   :  { %3581 = sst [smem:[#allocation23_spill]] %s3550_s6 }
   0x7   :  { %3582 = sst [smem:[#allocation24_spill]] %s3551_s7 }
   0x8   :  { %3583 = sst [smem:[#allocation25_spill]] %s3552_s8 }
   0x9   :  { %3584 = sst [smem:[#allocation26_spill]] %s3559_s15 }
   0xa   :  { %20 = vsyncpa [#allocation3], 0 }
   0xb   :  { %22 = vsyncpa [#allocation3 + $0x1], 0  ;;  %s3071_s18 = smov 0   ;;  %s3073_s19 = smov 0  }
   0xc   :  { %s3075_s20 = smov 0   ;;  %s3077_s21 = smov 0  }
   0xd   :  { %s3079_s22 = smov 0   ;;  %s3081_s23 = smov 0  }
   0xe   :  { %s3083_s24 = smov 0   ;;  %s3085_s25 = smov 0  }
   0xf LB: > { %3585 = sst [smem:[#allocation5_spill]] %s2949_s18  ;;  %s2357_s26 = sadd.s32 4294967295, %s2977_s25   ;;  %s2977_s25 = sphi %s3085_s25, %s28_s25   ;;  %s2973_s24 = sphi %s3083_s24, %s3630_s24   ;;  %s2969_s23 = sphi %s3081_s23, %s3629_s23   ;;  %s2965_s22 = sphi %s3079_s22, %s3628_s22   ;;  %s2961_s21 = sphi %s3077_s21, %s3627_s21   ;;  %s2957_s20 = sphi %s3075_s20, %s3626_s20   ;;  %s2953_s19 = sphi %s3073_s19, %s3625_s19   ;;  %s2949_s18 = sphi %s3071_s18, %s3624_s18  }
  0x10   : > { %3586 = sst [smem:[#allocation6_spill]] %s2953_s19  ;;  %s2358_s27 = sadd.s32 4294967294, %s2977_s25  }
  0x11   : > { %3587 = sst [smem:[#allocation7_spill]] %s2957_s20  ;;  %s37_s28 = sadd.s32 1, %s2969_s23 }
  0x12   : > { %3588 = sst [smem:[#allocation8_spill]] %s2961_s21  ;;  %p38_p0 = scmp.ge.s32.totalorder %s37_s28, 2 }
  0x13   : > { %3589 = sst [smem:[#allocation9_spill]] %s2965_s22  ;;  %s40_s29 = sadd.s32 1, %s2973_s24 }
  0x14   : > { %3590 = sst [smem:[#allocation10_spill]] %s2969_s23  ;;  %p437_p1 = scmp.ne.s32.totalorder %s2957_s20, %s2953_s19 }
  0x15   : > { %3591 = sst [smem:[#allocation11_spill]] %s2973_s24  ;;  %p438_p2 = scmp.eq.s32.totalorder %s2357_s26, 3 }
  0x16   : > { %3592 = sst [smem:[#allocation12_spill]] %s2977_s25  ;;  %s3632_s28 = smov (%p38_p0, %s37_s28), 0 }
  0x17   : > { %3593 = sst [smem:[#allocation13_spill]] %s3632_s28  ;;  %s3634_s29 = smov (!%p38_p0, %s40_s29), %s2973_s24 }
  0x18   : > { %p3120_p3 = por %p438_p2, %p437_p1  ;;  %p443_p4 = scmp.ne.s32.totalorder %s2953_s19, %s2949_s18 }
  0x19   : > { %p42_p5 = scmp.ge.s32.totalorder %s3634_s29, 2  ;;  %p444_p6 = scmp.eq.s32.totalorder %s2358_s27, 3 }
  0x1a   : > { %s3594_s30 = scalar_select %p3120_p3, 1, 0 }
  0x1b   : > { %p2361_p7 = scmp.ge.s32.totalorder %s2977_s25, 1  ;;  %p559_p8 = scmp.lt.s32.totalorder %s2977_s25, 5 }
  0x1c   : > { %3595 = sst [smem:[#allocation14_spill]] %s3594_s30  ;;  %s3636_s29 = smov (%p42_p5, %s3634_s29), 0 }
  0x1d   : > { %3596 = sst [smem:[#allocation15_spill]] %s3636_s29  ;;  %p3130_p9 = por %p444_p6, %p443_p4 }
  0x1e   : > { %p560_p10 = pnand %p2361_p7, %p559_p8  ;;  %s424_s17 = ssub.s32 %s2973_s24, %s3636_s29 }
  0x1f   : > { %s3597_s16 = scalar_select %p3130_p9, 1, 0 }
  0x20   : > { %s427_s26 = sadd.s32 1, %s2957_s20  ;;  %p425_p11 = scmp.eq.s32.totalorder %s424_s17, 0 }
  0x21   : > { %3598 = sst [smem:[#allocation16_spill]] %s3597_s16  ;;  %563 = sbr.rel (%p560_p10) target bundleno = 4295 (0x10c7), region = 80 }
  0x22   : > { %s3138_s28 = scalar_select %p425_p11, %s2957_s20, %s427_s26  }
  0x23   : > { %s3565_s27 = sand.u32 (!%p560_p10), 1, %s2953_s19   ;;  %p654_p12 = scmp.lt.s32.totalorder (!%p560_p10), %s2965_s22, 1 }
  0x24   : > { %3599 = sst [smem:[#allocation17_spill]] %s3138_s28  ;;  %s2362_s23 = sshll.u32 (!%p560_p10), %s3565_s27, 3 }
  0x25   : > { %p658_p13 = scmp.lt.s32.totalorder (!%p560_p10), %s2961_s21, 1  ;;  %s3600_s0 = sld [smem:[#allocation18_spill]] (!%p560_p10) }
  0x26   : > { %s3602_s5 = sld [smem:[#allocation22_spill]] (!%p560_p10)  ;;  %s3603_s6 = sld [smem:[#allocation23_spill]] (!%p560_p10) }
  0x27   : > { %s3604_s7 = sld [smem:[#allocation24_spill]] (!%p560_p10)  ;;  %s3605_s8 = sld [smem:[#allocation25_spill]] (!%p560_p10) }
  0x28   : > { %s655_s18 = scalar_select %p654_p12, %s2965_s22, 1 }
  0x29   : > { %s3147_s16 = scalar_select %p658_p13, %s2961_s21, 1 }
  0x2a   : > { %s2363_s17 = sshll.u32 %s655_s18, 3 }
  0x2b   : > { %s3152_s24 = scalar_lea.vmem %s3600_s0, %s2363_s17  ;;  %s2443_s19 = sshll.u32 %s3147_s16, 6 }
  0x2c   : > { %s3166_s1 = scalar_lea.vmem %s3602_s5, %s2443_s19  ;;  %s3171_s29 = scalar_lea.vmem %s3603_s6, %s2443_s19 }
  0x2d   : > { %s3176_s28 = scalar_lea.vmem %s3604_s7, %s2443_s19  ;;  %s2446_s27 = sshll.u32 %s3147_s16, 4 }
  0x2e   : > { %s3182_s25 = scalar_lea.vmem %s3605_s8, %s2446_s27  ;;  %s3195_s17 = scalar_lea.vmem %s3555_s11, %s2443_s19 }
  0x2f   : > { %s697_s4 = scalar_lea.vmem %s3556_s12, %s3147_s16  ;;  %s3204_s15 = scalar_lea.vmem %s3557_s13, %s2443_s19 }
  0x30   : > { %s705_s22 = scalar_lea.vmem %s3558_s14, %s3147_s16  ;;  %s3210_s0 = scalar_lea.vmem [#allocation2], %s2362_s23 }
  0x31   : > { %s3606_s5 = sld [smem:[#allocation8_spill]] }
  0x37   : > { %p2376_p0 = scmp.ne.s32.totalorder %s3606_s5, 0 }
  0x38   : > { %s3607_s21 = sld [smem:[#allocation19_spill]] (!%p2376_p0)  ;;  %v2979_v3 = vmov (!%p2376_p0), 0.0|0.0   ;;  %vm2980_vm0 = vmmov (!%p2376_p0), 0   ;;  %v2981_v6 = vmov (!%p2376_p0), 0.0   ;;  %v711_v26 = vld [vmem:[%s3152_s24] sm:$0xff] (!%p2376_p0)  ;;  %s3609_s2 = sld [smem:[#allocation20_spill]] (!%p2376_p0) }
  0x39   : > { %710 = sbr.rel (%p2376_p0) target bundleno = 312 (0x138), region = 84  ;;  %2713 = vmatprep.subr.bf16.mxu0 (!%p2376_p0), %v2979_v3  ;;  %2562 = vmatprep.mubr.msk.f32.mxu0 (!%p2376_p0), %vm2980_vm0, %v2981_v6 }
  0x3e   : > { %s3608_s8 = smov (!%p2376_p0), %s3607_s21  ;;  %v712_v0 = vld [vmem:[%s3607_s21] sm:$0xff] (!%p2376_p0) }
  0x3f   : > { %v713_v1 = vld [vmem:[%s3608_s8 + $0x8] sm:$0xff] (!%p2376_p0)  ;;  %v714_v2 = vld [vmem:[%s3608_s8 + $0x10] sm:$0xff] (!%p2376_p0)  ;;  %v715_v5 = vld [vmem:[%s3608_s8 + $0x18] sm:$0xff] (!%p2376_p0) }
  0x40   : > { %v2714_v4 = vpack.c.bf16 %v713_v1, %v712_v0  ;;  %v2717_v7 = vpack.c.bf16 %v715_v5, %v714_v2  ;;  %v716_v8 = vld [vmem:[%s3608_s8 + $0x20] sm:$0xff]  ;;  %v717_v9 = vld [vmem:[%s3608_s8 + $0x28] sm:$0xff]  ;;  %v718_v11 = vld [vmem:[%s3608_s8 + $0x30] sm:$0xff] }
  0x41   : > { %v2720_v10 = vpack.c.bf16 %v717_v9, %v716_v8  ;;  %v719_v12 = vld [vmem:[%s3608_s8 + $0x38] sm:$0xff]  ;;  %v720_v14 = vld [vmem:[%s3608_s8 + $0x40] sm:$0xff]  ;;  %v721_v15 = vld [vmem:[%s3608_s8 + $0x48] sm:$0xff] }
  0x42   : > { %2715 = vmatpush3.bf16.msra.mxu0 %v2714_v4  ;;  %v2723_v13 = vpack.c.bf16 %v719_v12, %v718_v11  ;;  %v2726_v16 = vpack.c.bf16 %v721_v15, %v720_v14  ;;  %v722_v17 = vld [vmem:[%s3608_s8 + $0x50] sm:$0xff]  ;;  %v723_v18 = vld [vmem:[%s3608_s8 + $0x58] sm:$0xff]  ;;  %v724_v20 = vld [vmem:[%s3608_s8 + $0x60] sm:$0xff] }
  0x43   : > { %2716 = vmatprep.subr.bf16.mxu0 %v2979_v3  ;;  %v2729_v19 = vpack.c.bf16 %v723_v18, %v722_v17  ;;  %v725_v21 = vld [vmem:[%s3608_s8 + $0x68] sm:$0xff]  ;;  %v726_v23 = vld [vmem:[%s3608_s8 + $0x70] sm:$0xff]  ;;  %v727_v24 = vld [vmem:[%s3608_s8 + $0x78] sm:$0xff] }
  0x44   : > { %v2732_v22 = vpack.c.bf16 %v725_v21, %v724_v20  ;;  %v2735_v25 = vpack.c.bf16 %v727_v24, %v726_v23  ;;  %v798_v27 = vld [vmem:[%s3609_s2] sm:$0xff] }
  0x46   : > { %2718 = vmatpush3.bf16.msra.mxu0 %v2717_v7 }
  0x47   : > { %2719 = vmatprep.subr.bf16.mxu0 %v2979_v3 }
  0x4a   : > { %2721 = vmatpush3.bf16.msra.mxu0 %v2720_v10 }
  0x4b   : > { %2722 = vmatprep.subr.bf16.mxu0 %v2979_v3 }
  0x4e   : > { %2724 = vmatpush3.bf16.msra.mxu0 %v2723_v13 }
  0x4f   : > { %2725 = vmatprep.subr.bf16.mxu0 %v2979_v3 }
  0x52   : > { %2727 = vmatpush3.bf16.msra.mxu0 %v2726_v16 }
  0x53   : > { %2728 = vmatprep.subr.bf16.mxu0 %v2979_v3 }
  0x56   : > { %2730 = vmatpush3.bf16.msra.mxu0 %v2729_v19 }
  0x57   : > { %2731 = vmatprep.subr.bf16.mxu0 %v2979_v3 }
  0x5a   : > { %2733 = vmatpush3.bf16.msra.mxu0 %v2732_v22 }
  0x5b   : > { %2734 = vmatprep.subr.bf16.mxu0 %v2979_v3 }
  0x5e   : > { %2736 = vmatpush3.bf16.msra.mxu0 %v2735_v25 }
  0x61   : > { %2563 = vmatmul.mubr.f32.vlgmr.msra.gmra.mrb[0].mxu0 %v711_v26 }
 0x134   : > { %v794_v28 = vpop.f32.mrb[0].mxu0 }
 0x135   : > { %v799_v29 = vadd.f32 %v798_v27, %v794_v28  ;;  %v2564_v30 = vpop.f32.mrb[1].mxu0 }
 0x137   : > { %800 = vst [vmem:[%s3210_s0] sm:$0xff] %v799_v29 }
 0x138 PF: > { %v2982_v32 = vmov 0.0   ;;  %v2819_v33 = vld [vmem:[%s3166_s1] sm:$0xff]   ;;  %v2821_v35 = vld [vmem:[%s3166_s1 + $0x8] sm:$0xff]   ;;  %v2823_v37 = vld [vmem:[%s3166_s1 + $0x10] sm:$0xff]   ;;  %v802_v38 = vlaneseq  ;;  %vm2983_vm2 = vmmov 0   ;;  %s3610_s5 = scalar_lea.vmem %s3547_s3, %s3147_s16  ;;  %s3611_s18 = sld [smem:[#allocation21_spill]] }
 0x139   : > { %2565 = vmatprep.subr.bf16.mxu0 %v2982_v32  ;;  %2585 = vmatprep.subr.bf16.mxu1 %v2982_v32  ;;  %v2820_v34 = vld [vmem:[%s3171_s29] sm:$0xff]   ;;  %v2822_v36 = vld [vmem:[%s3171_s29 + $0x8] sm:$0xff]   ;;  %v2824_v46 = vld [vmem:[%s3171_s29 + $0x10] sm:$0xff]   ;;  %vm1148_vm3 = vcmask 64512   ;;  %s2984_s26 = smov 120   ;;  %s2986_s20 = smov 104  }
 0x13a   : > { %2566 = vmatpush3.bf16.msra.mxu0 %v2819_v33  ;;  %2586 = vmatpush3.bf16.msra.mxu1 %v2820_v34  ;;  %v803_v39 = vand.u32 127, %v802_v38  ;;  %v2825_v47 = vld [vmem:[%s3166_s1 + $0x18] sm:$0xff]   ;;  %v2827_v49 = vld [vmem:[%s3166_s1 + $0x20] sm:$0xff]   ;;  %v2829_v51 = vld [vmem:[%s3166_s1 + $0x28] sm:$0xff]   ;;  %s2987_s19 = smov 16   ;;  %s2988_s23 = smov 8  }
 0x13b   : > { %2567 = vmatprep.subr.bf16.mxu0 %v2982_v32  ;;  %2587 = vmatprep.subr.bf16.mxu1 %v2982_v32  ;;  %v2826_v48 = vld [vmem:[%s3171_s29 + $0x18] sm:$0xff]   ;;  %v2828_v50 = vld [vmem:[%s3171_s29 + $0x20] sm:$0xff]   ;;  %v2830_v52 = vld [vmem:[%s3171_s29 + $0x28] sm:$0xff]   ;;  %s2989_s27 = smov 24   ;;  %vm1818_vm4 = vcmask 130048   ;;  %vm1820_vm5 = vcmask 195584   ;;  %s3613_s30 = scalar_lea.vmem %s3553_s9, %s3147_s16 }
 0x13c   : > { %vm804_vm1 = vcmp.lt.s32.totalorder %v803_v39, 32  ;;  %2581 = vmatprep.mubr.msk.bf16.mxu0 %vm2983_vm2, %v2982_v32  ;;  %2601 = vmatprep.mubr.msk.bf16.mxu1 %vm2983_vm2, %v2982_v32  ;;  %v2831_v53 = vld [vmem:[%s3166_s1 + $0x30] sm:$0xff]   ;;  %v2833_v55 = vld [vmem:[%s3166_s1 + $0x38] sm:$0xff]   ;;  %v2378_v61 = vld [vmem:[%s3610_s5] ss:$0 sm:$0xff]  ;;  %vm1839_vm6 = vcmask 261120   ;;  %s3614_s1 = scalar_lea.vmem %s3554_s10, %s3147_s16 }
 0x13d   : > { %v3283_v42 = vsel %vm804_vm1, 1.0, %v2982_v32  ;;  %v2832_v54 = vld [vmem:[%s3171_s29 + $0x30] sm:$0xff]   ;;  %v2834_v56 = vld [vmem:[%s3171_s29 + $0x38] sm:$0xff]   ;;  %v2835_v2 = vld [vmem:[%s3176_s28] sm:$0xff]   ;;  %s3615_s29 = sld [smem:[#allocation9_spill]]  ;;  %s2990_s21 = smov [#allocation2]  }
 0x13e   : > { %v3267_v31 = vld [vmem:[%s3210_s0] sm:$0xff]  ;;  %2568 = vmatpush3.bf16.msra.mxu0 %v2821_v35  ;;  %2588 = vmatpush3.bf16.msra.mxu1 %v2822_v36  ;;  %s3612_s7 = scalar_lea.vmem %s3611_s18, %s3147_s16  ;;  %v2837_v5 = vld [vmem:[%s3176_s28 + $0x10] sm:$0xff]   ;;  %v2838_v6 = vld [vmem:[%s3176_s28 + $0x18] sm:$0xff]  }
 0x13f   : > { %809 = vadd.xlane.f32.xlu0 %v3267_v31  ;;  %2569 = vmatprep.subr.bf16.mxu0 %v2982_v32  ;;  %v2379_v63 = vld [vmem:[%s3612_s7] ss:$0 sm:$0xff]  ;;  %v2836_v4 = vld [vmem:[%s3176_s28 + $0x8] sm:$0xff]   ;;  %v2841_v9 = vld [vmem:[%s3176_s28 + $0x30] sm:$0xff]  }
 0x140   : > { %2589 = vmatprep.subr.bf16.mxu1 %v2982_v32  ;;  %v2839_v7 = vld [vmem:[%s3176_s28 + $0x20] sm:$0xff]   ;;  %v2840_v8 = vld [vmem:[%s3176_s28 + $0x28] sm:$0xff]   ;;  %v2842_v10 = vld [vmem:[%s3176_s28 + $0x38] sm:$0xff]   ;;  %s2985_s28 = smov 112  }
 0x142   : > { %2570 = vmatpush3.bf16.msra.mxu0 %v2823_v37  ;;  %2590 = vmatpush3.bf16.msra.mxu1 %v2824_v46 }
 0x143   : > { %2571 = vmatprep.subr.bf16.mxu0 %v2982_v32  ;;  %2591 = vmatprep.subr.bf16.mxu1 %v2982_v32  ;;  %s2440_s7 = sshll.u32 %s3615_s29, 7 }
 0x146   : > { %2572 = vmatpush3.bf16.msra.mxu0 %v2825_v47  ;;  %2592 = vmatpush3.bf16.msra.mxu1 %v2826_v48 }
 0x147   : > { %2573 = vmatprep.subr.bf16.mxu0 %v2982_v32  ;;  %2593 = vmatprep.subr.bf16.mxu1 %v2982_v32 }
 0x14a   : > { %2574 = vmatpush3.bf16.msra.mxu0 %v2827_v49  ;;  %2594 = vmatpush3.bf16.msra.mxu1 %v2828_v50 }
 0x14b   : > { %2575 = vmatprep.subr.bf16.mxu0 %v2982_v32  ;;  %2595 = vmatprep.subr.bf16.mxu1 %v2982_v32 }
 0x14e   : > { %2576 = vmatpush3.bf16.msra.mxu0 %v2829_v51  ;;  %2596 = vmatpush3.bf16.msra.mxu1 %v2830_v52 }
 0x14f   : > { %2577 = vmatprep.subr.bf16.mxu0 %v2982_v32  ;;  %2597 = vmatprep.subr.bf16.mxu1 %v2982_v32 }
 0x152   : > { %2578 = vmatpush3.bf16.msra.mxu0 %v2831_v53  ;;  %2598 = vmatpush3.bf16.msra.mxu1 %v2832_v54 }
 0x153   : > { %2579 = vmatprep.subr.bf16.mxu0 %v2982_v32  ;;  %2599 = vmatprep.subr.bf16.mxu1 %v2982_v32 }
 0x156   : > { %2580 = vmatpush3.bf16.msra.mxu0 %v2833_v55  ;;  %2600 = vmatpush3.bf16.msra.mxu1 %v2834_v56 }
 0x157   : > { %2605 = vmatprep.subr.bf16.mxu0 %v2982_v32  ;;  %2625 = vmatprep.subr.mxu1 %v2982_v32 }
 0x1cc   : > { %v810_v40 = vpop.xlane.xlu0 %809 }
 0x1cd   : > { %v811_v41 = vmul.f32 0.03125, %v810_v40 }
 0x1cf   : > { %v812_v43 = vsub.f32 %v3267_v31, %v811_v41 }
 0x1d1   : > { %v813_v44 = vmul.f32 %v3283_v42, %v812_v43 }
 0x1d3   : > { %v814_v45 = vmul.f32 %v813_v44, %v813_v44 }
 0x1d5   : > { %815 = vadd.xlane.f32.xlu0 %v814_v45 }
 0x262   : > { %v816_v57 = vpop.xlane.xlu0 %815 }
 0x263   : > { %v817_v58 = vmul.f32 0.03125, %v816_v57 }
 0x265   : > { %v818_v59 = vadd.f32 1e-05, %v817_v58 }
 0x267   : > { %2861 = vrsqrt.f32 %v818_v59 }
 0x271   : > { %v2862_v60 = vpop.eup %2861 }
 0x272   : > { %v820_v62 = vmul.f32 %v2862_v60, %v813_v44 }
 0x274   : > { %v827_v0 = vmul.f32 %v2378_v61, %v820_v62 }
 0x276   : > { %v834_v1 = vadd.f32 %v2379_v63, %v827_v0 }
 0x278   : > { %v835_v3 = vpack.c.bf16 %v834_v1, %v834_v1 }
 0x27a   : > { %2582 = vmatmul.mubr.bf16.vlgmr.msra.gmra.mrb[0].mxu0 %v835_v3  ;;  %2602 = vmatmul.mubr.bf16.vlgmr.msra.gmra.mrb[0].mxu1 %v835_v3 }
 0x27b   : > { %2606 = vmatpush3.bf16.msra.mxu0 %v2835_v2  ;;  %2621 = vmatprep.mubr.msk.bf16.mxu0 %vm2983_vm2, %v2982_v32 }
 0x27c   : > { %2607 = vmatprep.subr.bf16.mxu0 %v2982_v32  ;;  %2627 = vmatprep.mubr.msk.f32.mxu1 %vm2983_vm2, %v2982_v32 }
 0x27f   : > { %2608 = vmatpush3.bf16.msra.mxu0 %v2836_v4 }
 0x280   : > { %2609 = vmatprep.subr.bf16.mxu0 %v2982_v32 }
 0x283   : > { %2610 = vmatpush3.bf16.msra.mxu0 %v2837_v5 }
 0x284   : > { %2611 = vmatprep.subr.bf16.mxu0 %v2982_v32 }
 0x287   : > { %2612 = vmatpush3.bf16.msra.mxu0 %v2838_v6 }
 0x288   : > { %2613 = vmatprep.subr.bf16.mxu0 %v2982_v32 }
 0x28b   : > { %2614 = vmatpush3.bf16.msra.mxu0 %v2839_v7 }
 0x28c   : > { %2615 = vmatprep.subr.bf16.mxu0 %v2982_v32 }
 0x28f   : > { %2616 = vmatpush3.bf16.msra.mxu0 %v2840_v8 }
 0x290   : > { %2617 = vmatprep.subr.bf16.mxu0 %v2982_v32 }
 0x293   : > { %2618 = vmatpush3.bf16.msra.mxu0 %v2841_v9 }
 0x294   : > { %2619 = vmatprep.subr.bf16.mxu0 %v2982_v32 }
 0x297   : > { %2620 = vmatpush3.bf16.msra.mxu0 %v2842_v10 }
 0x298   : > { %2665 = vmatprep.subr.bf16.mxu0 %v2982_v32 }
 0x29a   : > { %2622 = vmatmul.mubr.bf16.vlgmr.msra.gmra.mrb[4].mxu0 %v835_v3 }
 0x29b   : > { %2669 = vmatprep.mubr.msk.bf16.mxu0 %vm2983_vm2, %v2982_v32 }
 0x34d   : > { %v3345_v11 = vpop.f32.mrb[0].mxu0  ;;  %v3347_v12 = vpop.f32.mrb[0].mxu1 }
 0x34e   : > { %1311 = vrot.lane.b32.xlu0 %v3347_v12, %s2984_s26  ;;  %v2583_v13 = vpop.f32.mrb[1].mxu0  ;;  %v2603_v14 = vpop.f32.mrb[1].mxu1  ;;  %2626 = vmatpush3.xpose.msk.msra.mxu1 %vm1148_vm3, %v3347_v12 }
 0x34f   : > { %v937_v15 = vpop.f32.mrb[2].mxu0  ;;  %v1041_v16 = vpop.f32.mrb[2].mxu1  ;;  %2630 = vmatprep.subr.mxu1 %v2982_v32 }
 0x350   : > { %v2584_v17 = vpop.f32.mrb[3].mxu0  ;;  %v2604_v18 = vpop.f32.mrb[3].mxu1 }
 0x351   : > { %2628 = vmatmul.mubr.msk.f32.vlgmr.msra.gmra.mrb[4].mxu1 %vm1148_vm3, %v3345_v11 }
 0x352   : > { %2632 = vmatprep.mubr.msk.f32.mxu1 %vm2983_vm2, %v2982_v32 }
 0x36d   : > { %v3358_v19 = vpop.f32.mrb[4].mxu0 }
 0x36e   : > { %v2623_v20 = vpop.f32.mrb[5].mxu0  ;;  %2631 = vmatpush3.msra.mxu1 %v3358_v19 }
 0x36f   : > { %v1145_v21 = vpop.f32.mrb[6].mxu0  ;;  %2635 = vmatprep.subr.mxu1 %v2982_v32 }
 0x370   : > { %v2624_v22 = vpop.f32.mrb[7].mxu0  ;;  %v2843_v21 = vld [vmem:[%s3182_s25] sm:$0xff]  }
 0x371   : > { %2666 = vmatpush3.bf16.msra.mxu0 %v2843_v21  ;;  %v2844_v22 = vld [vmem:[%s3182_s25 + $0x8] sm:$0xff]  }
 0x372   : > { %2667 = vmatprep.subr.bf16.mxu0 %v2982_v32 }
 0x375   : > { %2668 = vmatpush3.bf16.msra.mxu0 %v2844_v22 }
 0x376   : > { %2693 = vmatprep.subr.bf16.mxu0 %v2982_v32 }
 0x3c0   : > { %v1312_v36 = vpop.permute.xlu0 %1311 }
 0x424   : > { %v1221_v23 = vpop.f32.mrb[4].mxu1 }
 0x425   : > { %v2629_v24 = vpop.f32.mrb[5].mxu1  ;;  %v1225_v25 = vsel %vm1148_vm3, %v1221_v23, -inf }
 0x426   : > { %1226 = vmax.xlane.f32.xlu1 %v1225_v25 }
 0x4b3   : > { %v1227_v26 = vpop.xlane.xlu1 %1226 }
 0x4b4   : > { %v1228_v27 = vsub.f32 %v1221_v23, %v1227_v26 }
 0x4b6   : > { %v1229_v28 = vmul.f32 1.442695, %v1228_v27 }
 0x4b8   : > { %2863 = vpow2.f32 %v1229_v28 }
 0x4c2   : > { %v2864_v29 = vpop.eup %2863 }
 0x4c3   : > { %v1231_v30 = vsel %vm1148_vm3, %v2864_v29, 0.0 }
 0x4c4   : > { %1232 = vadd.xlane.f32.xlu1 %v1231_v30 }
 0x4d5   : > { %1309 = vrot.lane.b32.xlu1 %v3345_v11, %s2984_s26 }
 0x551   : > { %v1233_v33 = vpop.xlane.xlu1 %1232 }
 0x552   : > { %2865 = vrcp.f32 %v1233_v33 }
 0x555   : > { %v1310_v37 = vpop.permute.xlu1 %1309 }
 0x55c   : > { %v2866_v34 = vpop.eup %2865 }
 0x55d   : > { %v1235_v35 = vmul.f32 %v2866_v34, %v2864_v29 }
 0x55f   : > { %2633 = vmatmul.mubr.msk.f32.vlgmr.msra.gmra.mrb[6].mxu1 %vm1148_vm3, %v1235_v35 }
 0x560   : > { %2636 = vmatpush3.xpose.msk.msra.mxu1 %vm1148_vm3, %v1312_v36  ;;  %2637 = vmatprep.mubr.msk.f32.mxu1 %vm2983_vm2, %v2982_v32 }
 0x561   : > { %2640 = vmatprep.subr.mxu1 %v2982_v32 }
 0x563   : > { %2638 = vmatmul.mubr.msk.f32.vlgmr.msra.gmra.mrb[8].mxu1 %vm1148_vm3, %v1310_v37 }
 0x564   : > { %2642 = vmatprep.mubr.msk.f32.mxu1 %vm2983_vm2, %v2982_v32 }
 0x632   : > { %v3374_v38 = vpop.f32.mrb[6].mxu1 }
 0x633   : > { %v2634_v39 = vpop.f32.mrb[7].mxu1 }
 0x634   : > { %v2845_v39 = vld [vmem:[%s3195_s17] sm:$0xff]  }
 0x636   : > { %v1383_v40 = vpop.f32.mrb[8].mxu1 }
 0x637   : > { %v2639_v41 = vpop.f32.mrb[9].mxu1  ;;  %v1387_v43 = vsel %vm1148_vm3, %v1383_v40, -inf }
 0x638   : > { %1388 = vmax.xlane.f32.xlu1 %v1387_v43 }
 0x649   : > { %1477 = vrot.lane.b32.xlu1 %v3347_v12, %s2985_s28 }
 0x64d   : > { %1475 = vrot.lane.b32.xlu1 %v3345_v11, %s2985_s28 }
 0x6c5   : > { %v1389_v44 = vpop.xlane.xlu1 %1388 }
 0x6c6   : > { %v1390_v45 = vsub.f32 %v1383_v40, %v1389_v44  ;;  %v2846_v40 = vld [vmem:[%s3195_s17 + $0x8] sm:$0xff]  }
 0x6c8   : > { %v1391_v46 = vmul.f32 1.442695, %v1390_v45 }
 0x6c9   : > { %v1478_v52 = vpop.permute.xlu1 %1477 }
 0x6ca   : > { %2867 = vpow2.f32 %v1391_v46  ;;  %v2847_v46 = vld [vmem:[%s3195_s17 + $0x10] sm:$0xff]  }
 0x6cd   : > { %v1476_v54 = vpop.permute.xlu1 %1475 }
 0x6d4   : > { %v2868_v47 = vpop.eup %2867 }
 0x6d5   : > { %v1393_v48 = vsel %vm1148_vm3, %v2868_v47, 0.0 }
 0x6d6   : > { %1394 = vadd.xlane.f32.xlu0 %v1393_v48  ;;  %v2849_v48 = vld [vmem:[%s3195_s17 + $0x20] sm:$0xff]  }
 0x6ec   : > { %1399 = vrot.lane.b32.xlu0 %v3358_v19, %s2984_s26  ;;  %s2161_s26 = sshll.u32 %s3210_s0, 4  ;;  %s3490_s26 = int_to_ptr.vmem [resolvable:$true] %s2161_s26 }
 0x6ed   : > { %s2883_s25 = scalar_lea.vmem %s3490_s26, 128 }
 0x6ee   : > { %p2884_p1 = scmp.ne.s32.totalorder %s3490_s26, %s2883_s25 }
 0x6f0   : > { %p2885_p2 = pnand %p2884_p1, %p3120_p3 }
 0x6f2   : > { %p2886_p4 = pneg %p2885_p2 }
 0x763   : > { %v1395_v49 = vpop.xlane.xlu0 %1394 }
 0x764   : > { %2869 = vrcp.f32 %v1395_v49  ;;  %v2850_v49 = vld [vmem:[%s3195_s17 + $0x28] sm:$0xff]  }
 0x767   : > { %v1400_v50 = vpop.permute.xlu0 %1399 }
 0x768   : > { %2641 = vmatpush3.msra.mxu1 %v1400_v50  ;;  %v2852_v50 = vld [vmem:[%s3195_s17 + $0x38] sm:$0xff]  }
 0x769   : > { %2645 = vmatprep.subr.mxu1 %v2982_v32 }
 0x76e   : > { %v2870_v51 = vpop.eup %2869 }
 0x76f   : > { %v1397_v53 = vmul.f32 %v2870_v51, %v2868_v47  ;;  %v2848_v47 = vld [vmem:[%s3195_s17 + $0x18] sm:$0xff]   ;;  %v2853_v51 = vld [vmem:[%s3204_s15] sm:$0xff]  }
 0x771   : > { %2643 = vmatmul.mubr.msk.f32.vlgmr.msra.gmra.mrb[10].mxu1 %vm1148_vm3, %v1397_v53 }
 0x772   : > { %2646 = vmatpush3.xpose.msk.msra.mxu1 %vm1148_vm3, %v1478_v52  ;;  %2647 = vmatprep.mubr.msk.f32.mxu1 %vm2983_vm2, %v2982_v32 }
 0x773   : > { %2650 = vmatprep.subr.mxu1 %v2982_v32 }
 0x775   : > { %2648 = vmatmul.mubr.msk.f32.vlgmr.msra.gmra.mrb[12].mxu1 %vm1148_vm3, %v1476_v54 }
 0x776   : > { %2652 = vmatprep.mubr.msk.f32.mxu1 %vm2983_vm2, %v2982_v32 }
 0x844   : > { %v1471_v55 = vpop.f32.mrb[10].mxu1 }
 0x845   : > { %v2644_v56 = vpop.f32.mrb[11].mxu1 }
 0x846   : > { %v2419_v56 = vld [vmem:[%s3613_s30] ss:$0 sm:$0xff]  ;;  %s2887_s30 = sshll.u32 %s2990_s21, 4  ;;  %s2888_s30 = int_to_ptr.vmem [resolvable:$false] %s2887_s30 }
 0x847   : > { %p2890_p5 = scmp.lt.s32.totalorder %s3490_s26, %s2888_s30 }
 0x848   : > { %v1549_v57 = vpop.f32.mrb[12].mxu1 }
 0x849   : > { %v2649_v58 = vpop.f32.mrb[13].mxu1  ;;  %v1553_v59 = vsel %vm1148_vm3, %v1549_v57, -inf }
 0x84a   : > { %1554 = vmax.xlane.f32.xlu1 %v1553_v59  ;;  %v2420_v58 = vld [vmem:[%s3614_s1] ss:$0 sm:$0xff] }
 0x85b   : > { %1642 = vrot.lane.b32.xlu1 %v3347_v12, %s2986_s20 }
 0x85f   : > { %1640 = vrot.lane.b32.xlu1 %v3345_v11, %s2986_s20 }
 0x8d7   : > { %v1555_v60 = vpop.xlane.xlu1 %1554 }
 0x8d8   : > { %v1556_v61 = vsub.f32 %v1549_v57, %v1555_v60 }
 0x8da   : > { %v1557_v62 = vmul.f32 1.442695, %v1556_v61 }
 0x8db   : > { %v1643_v4 = vpop.permute.xlu1 %1642 }
 0x8dc   : > { %2871 = vpow2.f32 %v1557_v62  ;;  %v2854_v62 = vld [vmem:[%s3204_s15 + $0x8] sm:$0xff]  }
 0x8df   : > { %v1641_v6 = vpop.permute.xlu1 %1640 }
 0x8e6   : > { %v2872_v63 = vpop.eup %2871 }
 0x8e7   : > { %v1559_v0 = vsel %vm1148_vm3, %v2872_v63, 0.0 }
 0x8e8   : > { %1560 = vadd.xlane.f32.xlu0 %v1559_v0  ;;  %v2856_v0 = vld [vmem:[%s3204_s15 + $0x18] sm:$0xff]  }
 0x8fe   : > { %1564 = vrot.lane.b32.xlu0 %v3358_v19, %s2985_s28 }
 0x975   : > { %v1561_v1 = vpop.xlane.xlu0 %1560 }
 0x976   : > { %2873 = vrcp.f32 %v1561_v1  ;;  %v2857_v1 = vld [vmem:[%s3204_s15 + $0x20] sm:$0xff]  }
 0x979   : > { %v1565_v2 = vpop.permute.xlu0 %1564 }
 0x97a   : > { %2651 = vmatpush3.msra.mxu1 %v1565_v2  ;;  %v2858_v2 = vld [vmem:[%s3204_s15 + $0x28] sm:$0xff]  }
 0x97b   : > { %2655 = vmatprep.subr.mxu1 %v2982_v32 }
 0x980   : > { %v2874_v3 = vpop.eup %2873 }
 0x981   : > { %v1563_v5 = vmul.f32 %v2874_v3, %v2872_v63  ;;  %v2855_v63 = vld [vmem:[%s3204_s15 + $0x10] sm:$0xff]  }
 0x982   : > { %v2859_v3 = vld [vmem:[%s3204_s15 + $0x30] sm:$0xff]  }
 0x983   : > { %2653 = vmatmul.mubr.msk.f32.vlgmr.msra.gmra.mrb[14].mxu1 %vm1148_vm3, %v1563_v5  ;;  %v2421_v5 = vld [vmem:[%s697_s4] ss:$0 sm:$0xff] }
 0x984   : > { %2656 = vmatpush3.xpose.msk.msra.mxu1 %vm1148_vm3, %v1643_v4  ;;  %2657 = vmatprep.mubr.msk.f32.mxu1 %vm2983_vm2, %v2982_v32  ;;  %v2860_v4 = vld [vmem:[%s3204_s15 + $0x38] sm:$0xff]   ;;  %s3616_s15 = sld [smem:[#allocation6_spill]] }
 0x985   : > { %2660 = vmatprep.subr.mxu1 %v2982_v32 }
 0x987   : > { %2658 = vmatmul.mubr.msk.f32.vlgmr.msra.gmra.mrb[16].mxu1 %vm1148_vm3, %v1641_v6 }
 0x988   : > { %2662 = vmatprep.mubr.msk.f32.mxu1 %vm2983_vm2, %v2982_v32 }
 0x98a   : > { %s3620_s16 = sand.u32 1, %s3616_s15  }
 0xa56   : > { %v1636_v7 = vpop.f32.mrb[14].mxu1 }
 0xa57   : > { %v2654_v8 = vpop.f32.mrb[15].mxu1 }
 0xa5a   : > { %v1714_v9 = vpop.f32.mrb[16].mxu1 }
 0xa5b   : > { %v2659_v10 = vpop.f32.mrb[17].mxu1  ;;  %v1718_v11 = vsel %vm1148_vm3, %v1714_v9, -inf }
 0xa5c   : > { %1719 = vmax.xlane.f32.xlu0 %v1718_v11 }
 0xa72   : > { %1729 = vrot.lane.b32.xlu0 %v3358_v19, %s2986_s20 }
 0xa76   : > { %1810 = vrot.lane.b32.xlu0 %v1636_v7, %s2987_s19  ;;  %s3618_s19 = sld [smem:[#allocation26_spill]] }
 0xae9   : > { %v1720_v12 = vpop.xlane.xlu0 %1719 }
 0xaea   : > { %v1721_v13 = vsub.f32 %v1714_v9, %v1720_v12 }
 0xaec   : > { %v1722_v14 = vmul.f32 1.442695, %v1721_v13 }
 0xaed   : > { %v1730_v15 = vpop.permute.xlu0 %1729 }
 0xaee   : > { %2875 = vpow2.f32 %v1722_v14  ;;  %2661 = vmatpush3.msra.mxu1 %v1730_v15 }
 0xaef   : > { %2673 = vmatprep.subr.bf16.mxu1 %v2982_v32 }
 0xaf1   : > { %v1811_v27 = vpop.permute.xlu0 %1810 }
 0xaf8   : > { %v2876_v16 = vpop.eup %2875 }
 0xaf9   : > { %v1724_v17 = vsel %vm1148_vm3, %v2876_v16, 0.0 }
 0xafa   : > { %1725 = vadd.xlane.f32.xlu1 %v1724_v17 }
 0xb0b   : > { %1806 = vrot.lane.b32.xlu1 %v1471_v55, %s2988_s23  ;;  %s3488_s23 = scalar_lea.hbm %s3618_s19, %s2440_s7 }
 0xb87   : > { %v1726_v18 = vpop.xlane.xlu1 %1725 }
 0xb88   : > { %2877 = vrcp.f32 %v1726_v18 }
 0xb8b   : > { %v1807_v25 = vpop.permute.xlu1 %1806 }
 0xb8c   : > { %v1817_v26 = vsel %vm1148_vm3, %v3374_v38, %v1807_v25 }
 0xb8d   : > { %v1819_v28 = vsel %vm1818_vm4, %v1817_v26, %v1811_v27 }
 0xb92   : > { %v2878_v19 = vpop.eup %2877 }
 0xb93   : > { %v1728_v20 = vmul.f32 %v2878_v19, %v2876_v16 }
 0xb95   : > { %2663 = vmatmul.mubr.msk.f32.vlgmr.msra.gmra.mrb[18].mxu1 %vm1148_vm3, %v1728_v20  ;;  %v2430_v20 = vld [vmem:[%s705_s22] ss:$0 sm:$0xff]  ;;  %s2148_s22 = scalar_lea.sflag [#allocation3], %s3620_s16 }
 0xb96   : > { %2689 = vmatprep.mubr.msk.bf16.mxu1 %vm2983_vm2, %v2982_v32  ;;  %2674 = vmatpush3.bf16.msra.mxu1 %v2845_v39 }
 0xb97   : > { %2675 = vmatprep.subr.bf16.mxu1 %v2982_v32 }
 0xb9a   : > { %2676 = vmatpush3.bf16.msra.mxu1 %v2846_v40 }
 0xb9b   : > { %2677 = vmatprep.subr.bf16.mxu1 %v2982_v32 }
 0xb9e   : > { %2678 = vmatpush3.bf16.msra.mxu1 %v2847_v46 }
 0xb9f   : > { %2679 = vmatprep.subr.bf16.mxu1 %v2982_v32 }
 0xba2   : > { %2680 = vmatpush3.bf16.msra.mxu1 %v2848_v47 }
 0xba3   : > { %2681 = vmatprep.subr.bf16.mxu1 %v2982_v32 }
 0xba6   : > { %2682 = vmatpush3.bf16.msra.mxu1 %v2849_v48 }
 0xba7   : > { %2683 = vmatprep.subr.bf16.mxu1 %v2982_v32 }
 0xbaa   : > { %2684 = vmatpush3.bf16.msra.mxu1 %v2850_v49 }
 0xbab   : > { %2685 = vmatprep.subr.bf16.mxu1 %v2982_v32 }
 0xc68   : > { %v1801_v23 = vpop.f32.mrb[18].mxu1 }
 0xc69   : > { %1814 = vrot.lane.b32.xlu1 %v1801_v23, %s2989_s27  ;;  %v2664_v24 = vpop.f32.mrb[19].mxu1  ;;  %s3619_s27 = smov %s3618_s19 }
 0xcdb   : > { %v1815_v29 = vpop.permute.xlu1 %1814 }
 0xcdc   : > { %v1821_v30 = vsel %vm1820_vm5, %v1819_v28, %v1815_v29 }
 0xcdd   : > { %v1822_v33 = vpack.c.bf16 %v1821_v30, %v1821_v30 }
 0xcdf   : > { %2670 = vmatmul.mubr.msk.bf16.vlgmr.msra.gmra.mrb[8].mxu0 %vm1839_vm6, %v1822_v33 }
 0xce0   : > { %2709 = vmatprep.mubr.msk.bf16.mxu0 %vm2983_vm2, %v2982_v32  ;;  %2694 = vmatpush3.bf16.msra.mxu0 %v2853_v51 }
 0xce1   : > { %2695 = vmatprep.subr.bf16.mxu0 %v2982_v32 }
 0xce4   : > { %2696 = vmatpush3.bf16.msra.mxu0 %v2854_v62 }
 0xce5   : > { %2697 = vmatprep.subr.bf16.mxu0 %v2982_v32 }
 0xce8   : > { %2698 = vmatpush3.bf16.msra.mxu0 %v2855_v63 }
 0xce9   : > { %2699 = vmatprep.subr.bf16.mxu0 %v2982_v32 }
 0xcec   : > { %2700 = vmatpush3.bf16.msra.mxu0 %v2856_v0 }
 0xced   : > { %2701 = vmatprep.subr.bf16.mxu0 %v2982_v32 }
 0xcf0   : > { %2702 = vmatpush3.bf16.msra.mxu0 %v2857_v1 }
 0xcf1   : > { %2703 = vmatprep.subr.bf16.mxu0 %v2982_v32 }
 0xcf4   : > { %2704 = vmatpush3.bf16.msra.mxu0 %v2858_v2 }
 0xcf5   : > { %2705 = vmatprep.subr.bf16.mxu0 %v2982_v32 }
 0xcf8   : > { %2706 = vmatpush3.bf16.msra.mxu0 %v2859_v3 }
 0xcf9   : > { %2707 = vmatprep.subr.bf16.mxu0 %v2982_v32 }
 0xcfc   : > { %2708 = vmatpush3.bf16.msra.mxu0 %v2860_v4 }
 0xdb2   : > { %v1877_v34 = vpop.f32.mrb[8].mxu0 }
 0xdb3   : > { %v3427_v35 = vadd.f32 %v1877_v34, %v3267_v31  ;;  %v2671_v36 = vpop.f32.mrb[9].mxu0 }
 0xdb4   : > { %v1880_v37 = vpop.f32.mrb[10].mxu0 }
 0xdb5   : > { %1886 = vadd.xlane.f32.xlu0 %v3427_v35  ;;  %v2672_v38 = vpop.f32.mrb[11].mxu0 }
 0xe42   : > { %v1887_v41 = vpop.xlane.xlu0 %1886 }
 0xe43   : > { %v1888_v31 = vmul.f32 0.03125, %v1887_v41 }
 0xe45   : > { %v1889_v43 = vsub.f32 %v3427_v35, %v1888_v31 }
 0xe47   : > { %v1890_v44 = vmul.f32 %v3283_v42, %v1889_v43  ;;  %v2851_v42 = vld [vmem:[%s3195_s17 + $0x30] sm:$0xff]   ;;  %s2889_s17 = scalar_lea.vmem %s2888_s30, 256 }
 0xe48   : > { %2686 = vmatpush3.bf16.msra.mxu1 %v2851_v42  ;;  %p2891_p6 = scmp.lt.s32.totalorder %s2889_s17, %s2883_s25 }
 0xe49   : > { %v1891_v45 = vmul.f32 %v1890_v44, %v1890_v44  ;;  %2687 = vmatprep.subr.bf16.mxu1 %v2982_v32 }
 0xe4a   : > { %p2892_p7 = por %p2891_p6, %p2890_p5 }
 0xe4b   : > { %1892 = vadd.xlane.f32.xlu1 %v1891_v45 }
 0xe4c   : > { %2688 = vmatpush3.bf16.msra.mxu1 %v2852_v50  ;;  %p2893_p8 = pnand %p2892_p7, %p2886_p4 }
 0xed8   : > { %v1893_v52 = vpop.xlane.xlu1 %1892 }
 0xed9   : > { %v1894_v53 = vmul.f32 0.03125, %v1893_v52 }
 0xedb   : > { %v1895_v54 = vadd.f32 1e-05, %v1894_v53 }
 0xedd   : > { %2879 = vrsqrt.f32 %v1895_v54 }
 0xee7   : > { %v2880_v55 = vpop.eup %2879 }
 0xee8   : > { %v1897_v57 = vmul.f32 %v2880_v55, %v1890_v44 }
 0xeea   : > { %v1904_v59 = vmul.f32 %v2419_v56, %v1897_v57 }
 0xeec   : > { %v1911_v60 = vadd.f32 %v2420_v58, %v1904_v59 }
 0xeee   : > { %v1912_v61 = vpack.c.bf16 %v1911_v60, %v1911_v60 }
 0xef0   : > { %2690 = vmatmul.mubr.bf16.vlgmr.msra.gmra.mrb[20].mxu1 %v1912_v61 }
 0xfc3   : > { %v2018_v6 = vpop.f32.mrb[20].mxu1 }
 0xfc4   : > { %v2019_v7 = vadd.f32 %v2421_v5, %v2018_v6  ;;  %v2691_v8 = vpop.f32.mrb[21].mxu1 }
 0xfc5   : > { %v2021_v9 = vpop.f32.mrb[22].mxu1 }
 0xfc6   : > { %v2025_v10 = vmul.f32 0.044715, %v2019_v7  ;;  %v2692_v11 = vpop.f32.mrb[23].mxu1  ;;  %v2024_v16 = vmul.f32 0.5, %v2019_v7 }
 0xfc8   : > { %v2026_v12 = vmul.f32 %v2025_v10, %v2019_v7 }
 0xfca   : > { %v2027_v13 = vmul.f32 %v2026_v12, %v2019_v7 }
 0xfcc   : > { %v2028_v14 = vadd.f32 %v2027_v13, %v2019_v7 }
 0xfce   : > { %v2029_v15 = vmul.f32 0.7978846, %v2028_v14 }
 0xfd0   : > { %2881 = vtanh.f32 %v2029_v15 }
 0xfda   : > { %v2882_v32 = vpop.eup %2881 }
 0xfdb   : > { %v2031_v17 = vadd.f32 1.0, %v2882_v32 }
 0xfdd   : > { %v2032_v18 = vmul.f32 %v2031_v17, %v2024_v16 }
 0xfdf   : > { %v2033_v19 = vpack.c.bf16 %v2032_v18, %v2032_v18 }
 0xfe1   : > { %2710 = vmatmul.mubr.bf16.vlgmr.msra.gmra.mrb[12].mxu0 %v2033_v19 }
0x10b4   : > { %v2139_v21 = vpop.f32.mrb[12].mxu0 }
0x10b5   : > { %v2140_v22 = vadd.f32 %v2430_v20, %v2139_v21  ;;  %v2711_v23 = vpop.f32.mrb[13].mxu0 }
0x10b6   : > { %v2142_v24 = vpop.f32.mrb[14].mxu0 }
0x10b7   : > { %v2145_v25 = vadd.f32 %v2140_v22, %v3427_v35  ;;  %v2712_v26 = vpop.f32.mrb[15].mxu0 }
0x10b9   : > { %2146 = vst [vmem:[%s3210_s0] sm:$0xff] %v2145_v25 }
0x10ba   : > { %2896 = shalt.err (!%p2893_p8)
}
0x10bb   : > { %s2897_s0 = scalar_lea.hbm %s3488_s23, 128  ;;  %s2901_s24 = scalar_lea.hbm %s3619_s27, 256 }
0x10bc   : > { %p2898_p10 = scmp.ne.s32.totalorder %s3488_s23, %s2897_s0  ;;  %p2902_p13 = scmp.lt.u32.totalorder %s3488_s23, %s3619_s27 }
0x10bd   : > { %p2903_p0 = scmp.lt.u32.totalorder %s2901_s24, %s2897_s0  ;;  %p2905_p2 = scmp.lt.u32.totalorder %s2897_s0, %s3488_s23 }
0x10be   : > { %p2899_p11 = pnand %p2898_p10, %p3120_p3 }
0x10bf   : > { %p2904_p1 = por %p2903_p0, %p2902_p13 }
0x10c0   : > { %p2900_p12 = pneg %p2899_p11 }
0x10c1   : > { %p2906_p4 = por %p2905_p2, %p2904_p1 }
0x10c3   : > { %p2907_p5 = pnand %p2906_p4, %p2900_p12 }
0x10c5   : > { %2910 = shalt.err (!%p2907_p5)
}
0x10c6   : > { %2737 = dma.vmem_to_hbm [thread:$0]  (%p3120_p3), %s3490_s26, 128, %s3488_s23, %s2148_s22  }
0x10c7 PF: > { %s3621_s15 = sld [smem:[#allocation12_spill]]  ;;  %s3622_s4 = sld [smem:[#allocation5_spill]] }
0x10cd   : > { %p2743_p6 = scmp.ge.s32.totalorder %s3621_s15, 2  ;;  %s2173_s7 = sand.u32 1, %s3622_s4  }
0x10ce   : > { %s2174_s28 = scalar_lea.sflag [#allocation3], %s2173_s7 }
0x10cf   : > { %p2740_p7 = pnand %p2743_p6, %p3130_p9 }
0x10d1   : > { %2944 = dma.done.wait (!%p2740_p7), %s2174_s28, 128  }
0x10d2   : > { %2946 = vsyncadd (!%p2740_p7), %s2174_s28, 4294967168  ;;  %s28_s25 = sadd.s32 1, %s3621_s15   ;;  %s3624_s18 = sld [smem:[#allocation6_spill]] }
0x10d3   : > { %p25_p8 = scmp.ge.s32.totalorder %s28_s25, 6   ;;  %s3625_s19 = sld [smem:[#allocation7_spill]] }
0x10d4   : > { %s3626_s20 = sld [smem:[#allocation17_spill]]  ;;  %s3627_s21 = sld [smem:[#allocation10_spill]] }
0x10d5   : > { %s3628_s22 = sld [smem:[#allocation11_spill]]  ;;  %s3629_s23 = sld [smem:[#allocation13_spill]] }
0x10d6   : > { %s3630_s24 = sld [smem:[#allocation15_spill]]  ;;  %27 = sbr.rel (!%p25_p8) target bundleno = 15 (0xf), region = 155 }
0x10dd   :  { %2179 = vsyncpa [#allocation3], 1 }
0x10de   :  { %2181 = vsyncpa [#allocation3 + $0x1], 1 }

</bundles_post_ra>
